<compile_context>
chip_gen: v7x
topology: tpu7x:2x2x1
jax: 0.10.0
libtpu: 0.0.40
codegen_flags: <defaults>
</compile_context>

<pallas_src>
import math

import jax
import jax.numpy as jnp
from jax.experimental import pallas as pl
from jax.experimental.pallas import tpu as pltpu

_LN_EPS = 1e-5
_NEG_SLOPE = 0.2
_LANE = 128


def _round_up(n, m):
    return ((n + m - 1) // m) * m


# --------------------------------------------------------------------------- #
# Parameter init (matches MetaAgent._init_weights).
# --------------------------------------------------------------------------- #
def init_meta_agent_params(key, total_embedding_dim, hidden_dims, out_dim):
    """xavier_uniform_ Linear weights, zero biases, LN gamma=1 / beta=0.
    Weights stored [in_features, out_features] so the kernel does x @ W + b."""
    params = {"hidden": [], "out": None}
    in_dim = total_embedding_dim
    for h in hidden_dims:
        key, sub = jax.random.split(key)
        limit = math.sqrt(6.0 / (in_dim + h))
        w = jax.random.uniform(sub, (in_dim, h), jnp.float32, -limit, limit)
        b = jnp.zeros((1, h), jnp.float32)
        gamma = jnp.ones((1, h), jnp.float32)
        beta = jnp.zeros((1, h), jnp.float32)
        params["hidden"].append((w, b, gamma, beta))
        in_dim = h
    key, sub = jax.random.split(key)
    limit = math.sqrt(6.0 / (in_dim + out_dim))
    w_out = jax.random.uniform(sub, (in_dim, out_dim), jnp.float32, -limit, limit)
    b_out = jnp.zeros((1, out_dim), jnp.float32)
    params["out"] = (w_out, b_out)
    return params


# --------------------------------------------------------------------------- #
# Lane-dense padding + packing of all 1xH vectors into ONE operand.
# Packing order per hidden layer: [bias, gamma, beta], then the output bias.
# gamma is padded with ZEROS so pad lanes stay exactly zero after LN+affine.
# --------------------------------------------------------------------------- #
def pad_params(params, matmul_dtype=jnp.bfloat16):
    weights = []
    vec_parts = []
    for (w, b, g, be) in params["hidden"]:
        in_d, h = w.shape
        in_p, h_p = _round_up(in_d, _LANE), _round_up(h, _LANE)
        wp = jnp.zeros((in_p, h_p), matmul_dtype).at[:in_d, :h].set(
            w.astype(matmul_dtype))
        weights.append(wp)
        vec_parts.append(jnp.zeros((1, h_p), jnp.float32).at[:, :h].set(b))
        vec_parts.append(jnp.zeros((1, h_p), jnp.float32).at[:, :h].set(g))
        vec_parts.append(jnp.zeros((1, h_p), jnp.float32).at[:, :h].set(be))
    w, b = params["out"]
    in_d, o = w.shape
    in_p, o_p = _round_up(in_d, _LANE), _round_up(o, _LANE)
    weights.append(jnp.zeros((in_p, o_p), matmul_dtype).at[:in_d, :o].set(
        w.astype(matmul_dtype)))
    vec_parts.append(jnp.zeros((1, o_p), jnp.float32).at[:, :o].set(b))
    return {"weights": weights, "vec": jnp.concatenate(vec_parts, axis=-1)}


# --------------------------------------------------------------------------- #
# Fused kernel: all layers in one body, activation stays resident in VMEM/vregs.
# --------------------------------------------------------------------------- #
def _make_fused_kernel(true_hidden_dims, hid_p, out_p, matmul_dtype):
    n_hidden = len(true_hidden_dims)

    def kernel(*refs):
        x_ref = refs[0]
        w_refs = refs[1:-2]        # n_hidden + 1 weight refs
        vec_ref = refs[-2]         # packed (1, V) f32: [b,g,be]*L + b_out
        o_ref = refs[-1]

        h = x_ref[...]             # already matmul_dtype (bf16 fast / f32 exact)
        off = 0
        for li in range(n_hidden):
            hp = hid_p[li]
            y = jnp.dot(h, w_refs[li][...], preferred_element_type=jnp.float32)
            b = vec_ref[:, off:off + hp]; off += hp      # static, 128-aligned
            g = vec_ref[:, off:off + hp]; off += hp
            be = vec_ref[:, off:off + hp]; off += hp
            y = y + b
            # LayerNorm over the TRUE width (pad lanes of y are exactly zero,
            # so padded-lane sums do not contribute).  E[x^2]-E[x]^2 form keeps
            # the two XLU reductions independent; fine in f32 at inference.
            inv_h = jnp.float32(1.0 / true_hidden_dims[li])
            mean = jnp.sum(y, axis=-1, keepdims=True) * inv_h
            msq = jnp.sum(y * y, axis=-1, keepdims=True) * inv_h
            var = jnp.maximum(msq - mean * mean, 0.0)
            yn = (y - mean) * jax.lax.rsqrt(var + _LN_EPS)
            yn = yn * g + be                              # gamma==0 on pad lanes
            act = jnp.maximum(yn, _NEG_SLOPE * yn)        # LeakyReLU: single vmax
            h = act.astype(matmul_dtype)
            # Dropout == identity (inference).
        y = jnp.dot(h, w_refs[n_hidden][...], preferred_element_type=jnp.float32)
        b_out = vec_ref[:, off:off + out_p]
        o_ref[...] = (y + b_out).astype(o_ref.dtype)

    return kernel


# --------------------------------------------------------------------------- #
# Sizing helpers.
# --------------------------------------------------------------------------- #
def _vmem_cap_bytes():
    """~75% of physical VMEM (v7x 64MiB -> ~48MiB, v5e/v6e 128MiB -> ~96MiB);
    v7x-safe fallback if the query is unavailable."""
    try:
        cap = int(getattr(pltpu.get_tpu_info(), "vmem_capacity_bytes", 0))
        if cap > 0:
            return (cap // 4) * 3
    except Exception:
        pass
    return 48 << 20


def _vmem_limit_bytes(tb, in_p, hid_p, out_p, w_itemsize, x_itemsize,
                      single_buffer, cap):
    widths = [in_p] + list(hid_p) + [out_p]
    wbuf = 1 if single_buffer else 2
    w_bytes = wbuf * sum(a * b * w_itemsize
                         for a, b in zip(widths[:-1], widths[1:]))
    vec_bytes = wbuf * 8 * (3 * sum(hid_p) + out_p) * 4   # (1,V) pads to 8 sublanes
    act_bytes = tb * sum(widths) * 4                      # resident f32 activations
    io_bytes = 2 * tb * (in_p * x_itemsize + out_p * 4)   # double-buffered x / out
    est = w_bytes + vec_bytes + act_bytes + io_bytes
    return int(min(max(2 * est, 4 << 20), cap))


def _pick_tb(B, tb_max, sublane):
    # >=2 grid steps whenever B allows (keeps v7x's 2nd TC busy under
    # "parallel" semantics) while minimizing padded-batch waste.
    half = -(-B // 2)
    return min(_round_up(max(half, sublane), sublane), tb_max)


def _supports_buffered_specs():
    try:
        pl.BlockSpec((8, 128), lambda i: (0, 0), pipeline_mode=pl.Buffered(1))
        return True
    except Exception:
        return False


# --------------------------------------------------------------------------- #
# Builder.
# --------------------------------------------------------------------------- #
def build_forward(total_embedding_dim, hidden_dims, out_dim,
                  matmul_dtype=jnp.bfloat16, tb_max=512):
    in_p = _round_up(total_embedding_dim, _LANE)
    hid_p = [_round_up(h, _LANE) for h in hidden_dims]
    out_p = _round_up(out_dim, _LANE)
    kernel = _make_fused_kernel(tuple(hidden_dims), tuple(hid_p), out_p,
                                matmul_dtype)
    w_itemsize = jnp.dtype(matmul_dtype).itemsize
    x_itemsize = w_itemsize
    sublane = 16 if x_itemsize == 2 else 8
    vmem_cap = _vmem_cap_bytes()
    vec_len = 3 * sum(hid_p) + out_p
    n_hidden = len(hidden_dims)

    call_cache = {}
    state = {"single_buffer": _supports_buffered_specs()}

    def _const_spec(shape, single_buffer):
        if single_buffer:
            return pl.BlockSpec(shape, lambda i: (0, 0),
                                pipeline_mode=pl.Buffered(1))
        return pl.BlockSpec(shape, lambda i: (0, 0))

    def _make_call(tb, bp, single_buffer):
        widths = [in_p] + hid_p
        in_specs = [pl.BlockSpec((tb, in_p), lambda i: (i, 0))]
        for li in range(n_hidden):
            in_specs.append(_const_spec((widths[li], hid_p[li]), single_buffer))
        in_specs.append(_const_spec((hid_p[-1], out_p), single_buffer))
        in_specs.append(_const_spec((1, vec_len), single_buffer))
        return pl.pallas_call(
            kernel,
            out_shape=jax.ShapeDtypeStruct((bp, out_p), jnp.float32),
            grid_spec=pltpu.PrefetchScalarGridSpec(
                num_scalar_prefetch=0,
                grid=(bp // tb,),
                in_specs=in_specs,
                out_specs=pl.BlockSpec((tb, out_p), lambda i: (i, 0)),
            ),
            compiler_params=pltpu.CompilerParams(
                dimension_semantics=("parallel",),
                vmem_limit_bytes=_vmem_limit_bytes(
                    tb, in_p, hid_p, out_p, w_itemsize, x_itemsize,
                    single_buffer, vmem_cap),
            ),
        )

    def _get_call(tb, bp, single_buffer):
        key = (tb, bp, single_buffer)
        fn = call_cache.get(key)
        if fn is None:
            fn = jax.jit(_make_call(tb, bp, single_buffer))
            call_cache[key] = fn
        return fn

    def forward(x, padded_params):
        B = x.shape[0]
        tb = _pick_tb(B, tb_max, sublane)
        bp = _round_up(B, tb)
        xp = jnp.pad(x, ((0, bp - B),
                         (0, in_p - total_embedding_dim))).astype(matmul_dtype)
        args = (xp, *padded_params["weights"], padded_params["vec"])
        if state["single_buffer"]:
            try:
                out = _get_call(tb, bp, True)(*args)
            except Exception:
                # Fallback for jax versions that reject Buffered(1) on the
                # top-level pipeline: default double-buffering.
                state["single_buffer"] = False
                out = _get_call(tb, bp, False)(*args)
        else:
            out = _get_call(tb, bp, False)(*args)
        return out[:B, :out_dim]

    return forward


# --------------------------------------------------------------------------- #
# Pure-JAX reference (unpadded, f32) for correctness checking.
# --------------------------------------------------------------------------- #
def _reference_forward(x, params):
    h = x
    for (w, b, gamma, beta) in params["hidden"]:
        y = h @ w + b
        mean = jnp.mean(y, axis=-1, keepdims=True)
        var = jnp.mean((y - mean) ** 2, axis=-1, keepdims=True)
        yn = (y - mean) / jnp.sqrt(var + _LN_EPS)
        yn = yn * gamma + beta
        h = jnp.where(yn >= 0, yn, _NEG_SLOPE * yn)
    w_out, b_out = params["out"]
    return h @ w_out + b_out


if __name__ == "__main__":
    batch = 48
    total_embedding_dim = 32
    hidden_dims = [64, 32]
    out_dim = 16

    key = jax.random.PRNGKey(0)
    key, xkey = jax.random.split(key)
    x = jax.random.normal(xkey, (batch, total_embedding_dim), jnp.float32)
    params = init_meta_agent_params(key, total_embedding_dim, hidden_dims, out_dim)
    ref = _reference_forward(x, params)

    # Exact f32 path (PyTorch-equivalent numerics).
    fwd_f32 = build_forward(total_embedding_dim, hidden_dims, out_dim,
                            matmul_dtype=jnp.float32)
    out_f32 = jax.block_until_ready(fwd_f32(x, pad_params(params, jnp.float32)))
    assert out_f32.shape == (batch, out_dim)
    assert jnp.allclose(out_f32, ref, atol=1e-4, rtol=1e-4), "f32 mismatch vs reference"

    # Default fast path: bf16 matmul inputs/weights, f32 accumulation + f32
    # LN/activation math (not PyTorch bit-equivalent; tolerance set accordingly).
    fwd_bf16 = build_forward(total_embedding_dim, hidden_dims, out_dim)
    out_bf16 = jax.block_until_ready(fwd_bf16(x, pad_params(params)))
    assert out_bf16.shape == (batch, out_dim)
    assert jnp.allclose(out_bf16, ref, atol=5e-2, rtol=5e-2), "bf16 mismatch vs reference"

    print("KERNEL_OK")
</pallas_src>

<mosaic_0001>
module attributes {stable_mosaic.version = 11 : i64} {
  func.func @kernel(%arg0: i32, %arg1: memref<24x128xf32, #tpu.memory_space<vmem>>, %arg2: memref<128x128xf32, #tpu.memory_space<vmem>>, %arg3: memref<128x128xf32, #tpu.memory_space<vmem>>, %arg4: memref<128x128xf32, #tpu.memory_space<vmem>>, %arg5: memref<1x896xf32, #tpu.memory_space<vmem>>, %arg6: memref<24x128xf32, #tpu.memory_space<vmem>>) attributes {dimension_semantics = [#tpu.dimension_semantics<parallel>], iteration_bounds = array<i64: 2>, scalar_prefetch = 0 : i64, scratch_operands = 0 : i64, tpu.core_type = #tpu.core_type<tc>, window_params = [{transform_indices = @transform_0, window_bounds = array<i64: 24, 128>}, {pipeline_mode = #tpu.pipeline_mode<synchronous>, transform_indices = @transform_1, window_bounds = array<i64: 128, 128>}, {pipeline_mode = #tpu.pipeline_mode<synchronous>, transform_indices = @transform_2, window_bounds = array<i64: 128, 128>}, {pipeline_mode = #tpu.pipeline_mode<synchronous>, transform_indices = @transform_3, window_bounds = array<i64: 128, 128>}, {pipeline_mode = #tpu.pipeline_mode<synchronous>, transform_indices = @transform_4, window_bounds = array<i64: 1, 896>}, {transform_indices = @transform_5, window_bounds = array<i64: 24, 128>}]} {
    %c0 = arith.constant 0 : index
    %c0_0 = arith.constant 0 : index
    %0 = vector.load %arg1[%c0, %c0_0] : memref<24x128xf32, #tpu.memory_space<vmem>>, vector<24x128xf32>
    %c0_1 = arith.constant 0 : index
    %c0_2 = arith.constant 0 : index
    %1 = vector.load %arg2[%c0_1, %c0_2] : memref<128x128xf32, #tpu.memory_space<vmem>>, vector<128x128xf32>
    %cst = arith.constant dense<0.000000e+00> : vector<24x128xf32>
    %2 = tpu.matmul %0, %1, %cst {dimension_numbers = #tpu.dot_dimension_numbers<[1], [0], [0], [1], [0, 0, 1, 1], [], []>} : vector<24x128xf32>, vector<128x128xf32>, vector<24x128xf32> -> vector<24x128xf32>
    %c0_3 = arith.constant 0 : index
    %c0_4 = arith.constant 0 : index
    %3 = vector.load %arg5[%c0_3, %c0_4] : memref<1x896xf32, #tpu.memory_space<vmem>>, vector<1x128xf32>
    %c0_5 = arith.constant 0 : index
    %c128 = arith.constant 128 : index
    %4 = vector.load %arg5[%c0_5, %c128] : memref<1x896xf32, #tpu.memory_space<vmem>>, vector<1x128xf32>
    %c0_6 = arith.constant 0 : index
    %c256 = arith.constant 256 : index
    %5 = vector.load %arg5[%c0_6, %c256] : memref<1x896xf32, #tpu.memory_space<vmem>>, vector<1x128xf32>
    %6 = vector.broadcast %3 : vector<1x128xf32> to vector<24x128xf32>
    %7 = arith.addf %2, %6 : vector<24x128xf32>
    %cst_7 = arith.constant dense<0.000000e+00> : vector<24xf32>
    %8 = vector.multi_reduction <add>, %7, %cst_7 [1] : vector<24x128xf32> to vector<24xf32>
    %9 = vector.shape_cast %8 : vector<24xf32> to vector<24x1xf32>
    %cst_8 = arith.constant 1.562500e-02 : f32
    %10 = vector.broadcast %cst_8 : f32 to vector<24x1xf32>
    %11 = arith.mulf %9, %10 : vector<24x1xf32>
    %12 = arith.mulf %7, %7 : vector<24x128xf32>
    %cst_9 = arith.constant dense<0.000000e+00> : vector<24xf32>
    %13 = vector.multi_reduction <add>, %12, %cst_9 [1] : vector<24x128xf32> to vector<24xf32>
    %14 = vector.shape_cast %13 : vector<24xf32> to vector<24x1xf32>
    %cst_10 = arith.constant 1.562500e-02 : f32
    %15 = vector.broadcast %cst_10 : f32 to vector<24x1xf32>
    %16 = arith.mulf %14, %15 : vector<24x1xf32>
    %17 = arith.mulf %11, %11 : vector<24x1xf32>
    %18 = arith.subf %16, %17 : vector<24x1xf32>
    %cst_11 = arith.constant 0.000000e+00 : f32
    %19 = vector.broadcast %cst_11 : f32 to vector<24x1xf32>
    %20 = arith.maximumf %18, %19 : vector<24x1xf32>
    %21 = vector.broadcast %11 : vector<24x1xf32> to vector<24x128xf32>
    %22 = arith.subf %7, %21 : vector<24x128xf32>
    %cst_12 = arith.constant 9.99999974E-6 : f32
    %23 = vector.broadcast %cst_12 : f32 to vector<24x1xf32>
    %24 = arith.addf %20, %23 : vector<24x1xf32>
    %25 = math.rsqrt %24 : vector<24x1xf32>
    %26 = vector.broadcast %25 : vector<24x1xf32> to vector<24x128xf32>
    %27 = arith.mulf %22, %26 : vector<24x128xf32>
    %28 = vector.broadcast %4 : vector<1x128xf32> to vector<24x128xf32>
    %29 = arith.mulf %27, %28 : vector<24x128xf32>
    %30 = vector.broadcast %5 : vector<1x128xf32> to vector<24x128xf32>
    %31 = arith.addf %29, %30 : vector<24x128xf32>
    %cst_13 = arith.constant 2.000000e-01 : f32
    %32 = vector.broadcast %cst_13 : f32 to vector<24x128xf32>
    %33 = arith.mulf %32, %31 : vector<24x128xf32>
    %34 = arith.maximumf %31, %33 : vector<24x128xf32>
    %c0_14 = arith.constant 0 : index
    %c0_15 = arith.constant 0 : index
    %35 = vector.load %arg3[%c0_14, %c0_15] : memref<128x128xf32, #tpu.memory_space<vmem>>, vector<128x128xf32>
    %cst_16 = arith.constant dense<0.000000e+00> : vector<24x128xf32>
    %36 = tpu.matmul %34, %35, %cst_16 {dimension_numbers = #tpu.dot_dimension_numbers<[1], [0], [0], [1], [0, 0, 1, 1], [], []>} : vector<24x128xf32>, vector<128x128xf32>, vector<24x128xf32> -> vector<24x128xf32>
    %c0_17 = arith.constant 0 : index
    %c384 = arith.constant 384 : index
    %37 = vector.load %arg5[%c0_17, %c384] : memref<1x896xf32, #tpu.memory_space<vmem>>, vector<1x128xf32>
    %c0_18 = arith.constant 0 : index
    %c512 = arith.constant 512 : index
    %38 = vector.load %arg5[%c0_18, %c512] : memref<1x896xf32, #tpu.memory_space<vmem>>, vector<1x128xf32>
    %c0_19 = arith.constant 0 : index
    %c640 = arith.constant 640 : index
    %39 = vector.load %arg5[%c0_19, %c640] : memref<1x896xf32, #tpu.memory_space<vmem>>, vector<1x128xf32>
    %40 = vector.broadcast %37 : vector<1x128xf32> to vector<24x128xf32>
    %41 = arith.addf %36, %40 : vector<24x128xf32>
    %cst_20 = arith.constant dense<0.000000e+00> : vector<24xf32>
    %42 = vector.multi_reduction <add>, %41, %cst_20 [1] : vector<24x128xf32> to vector<24xf32>
    %43 = vector.shape_cast %42 : vector<24xf32> to vector<24x1xf32>
    %cst_21 = arith.constant 3.125000e-02 : f32
    %44 = vector.broadcast %cst_21 : f32 to vector<24x1xf32>
    %45 = arith.mulf %43, %44 : vector<24x1xf32>
    %46 = arith.mulf %41, %41 : vector<24x128xf32>
    %cst_22 = arith.constant dense<0.000000e+00> : vector<24xf32>
    %47 = vector.multi_reduction <add>, %46, %cst_22 [1] : vector<24x128xf32> to vector<24xf32>
    %48 = vector.shape_cast %47 : vector<24xf32> to vector<24x1xf32>
    %cst_23 = arith.constant 3.125000e-02 : f32
    %49 = vector.broadcast %cst_23 : f32 to vector<24x1xf32>
    %50 = arith.mulf %48, %49 : vector<24x1xf32>
    %51 = arith.mulf %45, %45 : vector<24x1xf32>
    %52 = arith.subf %50, %51 : vector<24x1xf32>
    %cst_24 = arith.constant 0.000000e+00 : f32
    %53 = vector.broadcast %cst_24 : f32 to vector<24x1xf32>
    %54 = arith.maximumf %52, %53 : vector<24x1xf32>
    %55 = vector.broadcast %45 : vector<24x1xf32> to vector<24x128xf32>
    %56 = arith.subf %41, %55 : vector<24x128xf32>
    %cst_25 = arith.constant 9.99999974E-6 : f32
    %57 = vector.broadcast %cst_25 : f32 to vector<24x1xf32>
    %58 = arith.addf %54, %57 : vector<24x1xf32>
    %59 = math.rsqrt %58 : vector<24x1xf32>
    %60 = vector.broadcast %59 : vector<24x1xf32> to vector<24x128xf32>
    %61 = arith.mulf %56, %60 : vector<24x128xf32>
    %62 = vector.broadcast %38 : vector<1x128xf32> to vector<24x128xf32>
    %63 = arith.mulf %61, %62 : vector<24x128xf32>
    %64 = vector.broadcast %39 : vector<1x128xf32> to vector<24x128xf32>
    %65 = arith.addf %63, %64 : vector<24x128xf32>
    %cst_26 = arith.constant 2.000000e-01 : f32
    %66 = vector.broadcast %cst_26 : f32 to vector<24x128xf32>
    %67 = arith.mulf %66, %65 : vector<24x128xf32>
    %68 = arith.maximumf %65, %67 : vector<24x128xf32>
    %c0_27 = arith.constant 0 : index
    %c0_28 = arith.constant 0 : index
    %69 = vector.load %arg4[%c0_27, %c0_28] : memref<128x128xf32, #tpu.memory_space<vmem>>, vector<128x128xf32>
    %cst_29 = arith.constant dense<0.000000e+00> : vector<24x128xf32>
    %70 = tpu.matmul %68, %69, %cst_29 {dimension_numbers = #tpu.dot_dimension_numbers<[1], [0], [0], [1], [0, 0, 1, 1], [], []>} : vector<24x128xf32>, vector<128x128xf32>, vector<24x128xf32> -> vector<24x128xf32>
    %c0_30 = arith.constant 0 : index
    %c768 = arith.constant 768 : index
    %71 = vector.load %arg5[%c0_30, %c768] : memref<1x896xf32, #tpu.memory_space<vmem>>, vector<1x128xf32>
    %72 = vector.broadcast %71 : vector<1x128xf32> to vector<24x128xf32>
    %73 = arith.addf %70, %72 : vector<24x128xf32>
    %c0_31 = arith.constant 0 : index
    %c0_32 = arith.constant 0 : index
    %74 = vector.load %arg6[%c0_31, %c0_32] : memref<24x128xf32, #tpu.memory_space<vmem>>, vector<24x128xf32>
    tpu.vector_store %arg6[%c0_31, %c0_32], %73 {strides = array<i32>} : memref<24x128xf32, #tpu.memory_space<vmem>>, vector<24x128xf32>,
    return
  }
  func.func @transform_0(%arg0: i32) -> (i32, i32) {
    %c0_i32 = arith.constant 0 : i32
    %c0_i32_0 = arith.constant 0 : i32
    return %arg0, %c0_i32 : i32, i32
  }
  func.func @transform_1(%arg0: i32) -> (i32, i32) {
    %c0_i32 = arith.constant 0 : i32
    %c0_i32_0 = arith.constant 0 : i32
    %c0_i32_1 = arith.constant 0 : i32
    return %c0_i32, %c0_i32_0 : i32, i32
  }
  func.func @transform_2(%arg0: i32) -> (i32, i32) {
    %c0_i32 = arith.constant 0 : i32
    %c0_i32_0 = arith.constant 0 : i32
    %c0_i32_1 = arith.constant 0 : i32
    return %c0_i32, %c0_i32_0 : i32, i32
  }
  func.func @transform_3(%arg0: i32) -> (i32, i32) {
    %c0_i32 = arith.constant 0 : i32
    %c0_i32_0 = arith.constant 0 : i32
    %c0_i32_1 = arith.constant 0 : i32
    return %c0_i32, %c0_i32_0 : i32, i32
  }
  func.func @transform_4(%arg0: i32) -> (i32, i32) {
    %c0_i32 = arith.constant 0 : i32
    %c0_i32_0 = arith.constant 0 : i32
    %c0_i32_1 = arith.constant 0 : i32
    return %c0_i32, %c0_i32_0 : i32, i32
  }
  func.func @transform_5(%arg0: i32) -> (i32, i32) {
    %c0_i32 = arith.constant 0 : i32
    %c0_i32_0 = arith.constant 0 : i32
    return %arg0, %c0_i32 : i32, i32
  }
}

module attributes {stable_mosaic.version = 11 : i64} {
  func.func @kernel(%arg0: i32, %arg1: memref<24x128xf32, #tpu.memory_space<vmem>>, %arg2: memref<128x128xf32, #tpu.memory_space<vmem>>, %arg3: memref<128x128xf32, #tpu.memory_space<vmem>>, %arg4: memref<128x128xf32, #tpu.memory_space<vmem>>, %arg5: memref<1x896xf32, #tpu.memory_space<vmem>>, %arg6: memref<24x128xf32, #tpu.memory_space<vmem>>) attributes {dimension_semantics = [#tpu.dimension_semantics<parallel>], iteration_bounds = array<i64: 2>, scalar_prefetch = 0 : i64, scratch_operands = 0 : i64, tpu.core_type = #tpu.core_type<tc>, window_params = [{transform_indices = @transform_0, window_bounds = array<i64: 24, 128>}, {pipeline_mode = #tpu.pipeline_mode<synchronous>, transform_indices = @transform_1, window_bounds = array<i64: 128, 128>}, {pipeline_mode = #tpu.pipeline_mode<synchronous>, transform_indices = @transform_2, window_bounds = array<i64: 128, 128>}, {pipeline_mode = #tpu.pipeline_mode<synchronous>, transform_indices = @transform_3, window_bounds = array<i64: 128, 128>}, {pipeline_mode = #tpu.pipeline_mode<synchronous>, transform_indices = @transform_4, window_bounds = array<i64: 1, 896>}, {transform_indices = @transform_5, window_bounds = array<i64: 24, 128>}]} {
    %c0 = arith.constant 0 : index
    %c0_0 = arith.constant 0 : index
    %0 = vector.load %arg1[%c0, %c0_0] : memref<24x128xf32, #tpu.memory_space<vmem>>, vector<24x128xf32>
    %c0_1 = arith.constant 0 : index
    %c0_2 = arith.constant 0 : index
    %1 = vector.load %arg2[%c0_1, %c0_2] : memref<128x128xf32, #tpu.memory_space<vmem>>, vector<128x128xf32>
    %cst = arith.constant dense<0.000000e+00> : vector<24x128xf32>
    %2 = tpu.matmul %0, %1, %cst {dimension_numbers = #tpu.dot_dimension_numbers<[1], [0], [0], [1], [0, 0, 1, 1], [], []>} : vector<24x128xf32>, vector<128x128xf32>, vector<24x128xf32> -> vector<24x128xf32>
    %c0_3 = arith.constant 0 : index
    %c0_4 = arith.constant 0 : index
    %3 = vector.load %arg5[%c0_3, %c0_4] : memref<1x896xf32, #tpu.memory_space<vmem>>, vector<1x128xf32>
    %c0_5 = arith.constant 0 : index
    %c128 = arith.constant 128 : index
    %4 = vector.load %arg5[%c0_5, %c128] : memref<1x896xf32, #tpu.memory_space<vmem>>, vector<1x128xf32>
    %c0_6 = arith.constant 0 : index
    %c256 = arith.constant 256 : index
    %5 = vector.load %arg5[%c0_6, %c256] : memref<1x896xf32, #tpu.memory_space<vmem>>, vector<1x128xf32>
    %6 = vector.broadcast %3 : vector<1x128xf32> to vector<24x128xf32>
    %7 = arith.addf %2, %6 : vector<24x128xf32>
    %cst_7 = arith.constant dense<0.000000e+00> : vector<24xf32>
    %8 = vector.multi_reduction <add>, %7, %cst_7 [1] : vector<24x128xf32> to vector<24xf32>
    %9 = vector.shape_cast %8 : vector<24xf32> to vector<24x1xf32>
    %cst_8 = arith.constant 1.562500e-02 : f32
    %10 = vector.broadcast %cst_8 : f32 to vector<24x1xf32>
    %11 = arith.mulf %9, %10 : vector<24x1xf32>
    %12 = arith.mulf %7, %7 : vector<24x128xf32>
    %cst_9 = arith.constant dense<0.000000e+00> : vector<24xf32>
    %13 = vector.multi_reduction <add>, %12, %cst_9 [1] : vector<24x128xf32> to vector<24xf32>
    %14 = vector.shape_cast %13 : vector<24xf32> to vector<24x1xf32>
    %cst_10 = arith.constant 1.562500e-02 : f32
    %15 = vector.broadcast %cst_10 : f32 to vector<24x1xf32>
    %16 = arith.mulf %14, %15 : vector<24x1xf32>
    %17 = arith.mulf %11, %11 : vector<24x1xf32>
    %18 = arith.subf %16, %17 : vector<24x1xf32>
    %cst_11 = arith.constant 0.000000e+00 : f32
    %19 = vector.broadcast %cst_11 : f32 to vector<24x1xf32>
    %20 = arith.maximumf %18, %19 : vector<24x1xf32>
    %21 = vector.broadcast %11 : vector<24x1xf32> to vector<24x128xf32>
    %22 = arith.subf %7, %21 : vector<24x128xf32>
    %cst_12 = arith.constant 9.99999974E-6 : f32
    %23 = vector.broadcast %cst_12 : f32 to vector<24x1xf32>
    %24 = arith.addf %20, %23 : vector<24x1xf32>
    %25 = math.rsqrt %24 : vector<24x1xf32>
    %26 = vector.broadcast %25 : vector<24x1xf32> to vector<24x128xf32>
    %27 = arith.mulf %22, %26 : vector<24x128xf32>
    %28 = vector.broadcast %4 : vector<1x128xf32> to vector<24x128xf32>
    %29 = arith.mulf %27, %28 : vector<24x128xf32>
    %30 = vector.broadcast %5 : vector<1x128xf32> to vector<24x128xf32>
    %31 = arith.addf %29, %30 : vector<24x128xf32>
    %cst_13 = arith.constant 2.000000e-01 : f32
    %32 = vector.broadcast %cst_13 : f32 to vector<24x128xf32>
    %33 = arith.mulf %32, %31 : vector<24x128xf32>
    %34 = arith.maximumf %31, %33 : vector<24x128xf32>
    %c0_14 = arith.constant 0 : index
    %c0_15 = arith.constant 0 : index
    %35 = vector.load %arg3[%c0_14, %c0_15] : memref<128x128xf32, #tpu.memory_space<vmem>>, vector<128x128xf32>
    %cst_16 = arith.constant dense<0.000000e+00> : vector<24x128xf32>
    %36 = tpu.matmul %34, %35, %cst_16 {dimension_numbers = #tpu.dot_dimension_numbers<[1], [0], [0], [1], [0, 0, 1, 1], [], []>} : vector<24x128xf32>, vector<128x128xf32>, vector<24x128xf32> -> vector<24x128xf32>
    %c0_17 = arith.constant 0 : index
    %c384 = arith.constant 384 : index
    %37 = vector.load %arg5[%c0_17, %c384] : memref<1x896xf32, #tpu.memory_space<vmem>>, vector<1x128xf32>
    %c0_18 = arith.constant 0 : index
    %c512 = arith.constant 512 : index
    %38 = vector.load %arg5[%c0_18, %c512] : memref<1x896xf32, #tpu.memory_space<vmem>>, vector<1x128xf32>
    %c0_19 = arith.constant 0 : index
    %c640 = arith.constant 640 : index
    %39 = vector.load %arg5[%c0_19, %c640] : memref<1x896xf32, #tpu.memory_space<vmem>>, vector<1x128xf32>
    %40 = vector.broadcast %37 : vector<1x128xf32> to vector<24x128xf32>
    %41 = arith.addf %36, %40 : vector<24x128xf32>
    %cst_20 = arith.constant dense<0.000000e+00> : vector<24xf32>
    %42 = vector.multi_reduction <add>, %41, %cst_20 [1] : vector<24x128xf32> to vector<24xf32>
    %43 = vector.shape_cast %42 : vector<24xf32> to vector<24x1xf32>
    %cst_21 = arith.constant 3.125000e-02 : f32
    %44 = vector.broadcast %cst_21 : f32 to vector<24x1xf32>
    %45 = arith.mulf %43, %44 : vector<24x1xf32>
    %46 = arith.mulf %41, %41 : vector<24x128xf32>
    %cst_22 = arith.constant dense<0.000000e+00> : vector<24xf32>
    %47 = vector.multi_reduction <add>, %46, %cst_22 [1] : vector<24x128xf32> to vector<24xf32>
    %48 = vector.shape_cast %47 : vector<24xf32> to vector<24x1xf32>
    %cst_23 = arith.constant 3.125000e-02 : f32
    %49 = vector.broadcast %cst_23 : f32 to vector<24x1xf32>
    %50 = arith.mulf %48, %49 : vector<24x1xf32>
    %51 = arith.mulf %45, %45 : vector<24x1xf32>
    %52 = arith.subf %50, %51 : vector<24x1xf32>
    %cst_24 = arith.constant 0.000000e+00 : f32
    %53 = vector.broadcast %cst_24 : f32 to vector<24x1xf32>
    %54 = arith.maximumf %52, %53 : vector<24x1xf32>
    %55 = vector.broadcast %45 : vector<24x1xf32> to vector<24x128xf32>
    %56 = arith.subf %41, %55 : vector<24x128xf32>
    %cst_25 = arith.constant 9.99999974E-6 : f32
    %57 = vector.broadcast %cst_25 : f32 to vector<24x1xf32>
    %58 = arith.addf %54, %57 : vector<24x1xf32>
    %59 = math.rsqrt %58 : vector<24x1xf32>
    %60 = vector.broadcast %59 : vector<24x1xf32> to vector<24x128xf32>
    %61 = arith.mulf %56, %60 : vector<24x128xf32>
    %62 = vector.broadcast %38 : vector<1x128xf32> to vector<24x128xf32>
    %63 = arith.mulf %61, %62 : vector<24x128xf32>
    %64 = vector.broadcast %39 : vector<1x128xf32> to vector<24x128xf32>
    %65 = arith.addf %63, %64 : vector<24x128xf32>
    %cst_26 = arith.constant 2.000000e-01 : f32
    %66 = vector.broadcast %cst_26 : f32 to vector<24x128xf32>
    %67 = arith.mulf %66, %65 : vector<24x128xf32>
    %68 = arith.maximumf %65, %67 : vector<24x128xf32>
    %c0_27 = arith.constant 0 : index
    %c0_28 = arith.constant 0 : index
    %69 = vector.load %arg4[%c0_27, %c0_28] : memref<128x128xf32, #tpu.memory_space<vmem>>, vector<128x128xf32>
    %cst_29 = arith.constant dense<0.000000e+00> : vector<24x128xf32>
    %70 = tpu.matmul %68, %69, %cst_29 {dimension_numbers = #tpu.dot_dimension_numbers<[1], [0], [0], [1], [0, 0, 1, 1], [], []>} : vector<24x128xf32>, vector<128x128xf32>, vector<24x128xf32> -> vector<24x128xf32>
    %c0_30 = arith.constant 0 : index
    %c768 = arith.constant 768 : index
    %71 = vector.load %arg5[%c0_30, %c768] : memref<1x896xf32, #tpu.memory_space<vmem>>, vector<1x128xf32>
    %72 = vector.broadcast %71 : vector<1x128xf32> to vector<24x128xf32>
    %73 = arith.addf %70, %72 : vector<24x128xf32>
    %c0_31 = arith.constant 0 : index
    %c0_32 = arith.constant 0 : index
    %74 = vector.load %arg6[%c0_31, %c0_32] : memref<24x128xf32, #tpu.memory_space<vmem>>, vector<24x128xf32>
    tpu.vector_store %arg6[%c0_31, %c0_32], %73 {strides = array<i32>} : memref<24x128xf32, #tpu.memory_space<vmem>>, vector<24x128xf32>,
    return
  }
  func.func @transform_0(%arg0: i32) -> (i32, i32) {
    %c0_i32 = arith.constant 0 : i32
    %c0_i32_0 = arith.constant 0 : i32
    return %arg0, %c0_i32 : i32, i32
  }
  func.func @transform_1(%arg0: i32) -> (i32, i32) {
    %c0_i32 = arith.constant 0 : i32
    %c0_i32_0 = arith.constant 0 : i32
    %c0_i32_1 = arith.constant 0 : i32
    return %c0_i32, %c0_i32_0 : i32, i32
  }
  func.func @transform_2(%arg0: i32) -> (i32, i32) {
    %c0_i32 = arith.constant 0 : i32
    %c0_i32_0 = arith.constant 0 : i32
    %c0_i32_1 = arith.constant 0 : i32
    return %c0_i32, %c0_i32_0 : i32, i32
  }
  func.func @transform_3(%arg0: i32) -> (i32, i32) {
    %c0_i32 = arith.constant 0 : i32
    %c0_i32_0 = arith.constant 0 : i32
    %c0_i32_1 = arith.constant 0 : i32
    return %c0_i32, %c0_i32_0 : i32, i32
  }
  func.func @transform_4(%arg0: i32) -> (i32, i32) {
    %c0_i32 = arith.constant 0 : i32
    %c0_i32_0 = arith.constant 0 : i32
    %c0_i32_1 = arith.constant 0 : i32
    return %c0_i32, %c0_i32_0 : i32, i32
  }
  func.func @transform_5(%arg0: i32) -> (i32, i32) {
    %c0_i32 = arith.constant 0 : i32
    %c0_i32_0 = arith.constant 0 : i32
    return %arg0, %c0_i32 : i32, i32
  }
}

</mosaic_0001>

<bundles_post_ra>
// kernel: tpu_custom_call.1
= control target key start
LH: loop header
LB: loop body
LE: loop exit
PB: predicated region body
PF: predicated region fallthrough
CT: control target
= control target key end

     0   :  { %10 = vsyncpa [#allocation3], 0  ;;  %s1864_s0 = inlined_call_operand.hbm [shape: f32[48,128], index: 0, kind: input, shape index: {}]   ;;  %s1865_s1 = inlined_call_operand.hbm [shape: f32[128,128], index: 1, kind: input, shape index: {}]   ;;  %s1866_s2 = inlined_call_operand.hbm [shape: f32[128,128], index: 2, kind: input, shape index: {}]   ;;  %s1867_s3 = inlined_call_operand.hbm [shape: f32[128,128], index: 3, kind: input, shape index: {}]   ;;  %s1868_s4 = inlined_call_operand.vmem [shape: f32[1,896], index: 4, kind: input, shape index: {}]   ;;  %s1869_s5 = inlined_call_operand.hbm [shape: f32[48,128], index: 5, kind: output, shape index: {}]  }
   0x1   :  { %12 = vsyncpa [#allocation3 + $0x1], 0 }
   0x2   :  { %13 = vsyncpa [#allocation6], 0 }
   0x3   :  { %14 = vsyncpa [#allocation9], 0 }
   0x4   :  { %15 = vsyncpa [#allocation4], 0 }
   0x5   :  { %17 = vsyncpa [#allocation4 + $0x1], 0  ;;  %s1477_s18 = smov 0   ;;  %s1479_s19 = smov 0  }
   0x6   :  { %s1481_s20 = smov 0   ;;  %s1483_s21 = smov 0  }
   0x7 LB: > { %s1498_s22 = sadd.s32 4294967295, %s1433_s21   ;;  %s856_s23 = sadd.s32 4294967294, %s1433_s21   ;;  %s1433_s21 = sphi %s1483_s21, %s1894_s21   ;;  %s1429_s20 = sphi %s1481_s20, %s1893_s20   ;;  %s1425_s19 = sphi %s1479_s19, %s1892_s19   ;;  %s1421_s18 = sphi %s1477_s18, %s1891_s18  }
   0x8   : > { %p43_p0 = scmp.ne.s32.totalorder %s1425_s19, %s1421_s18  ;;  %p1870_p1 = scmp.eq.s32.totalorder %s1498_s22, 0 }
   0x9   : > { %p157_p3 = scmp.eq.s32.totalorder %s856_s23, 1  ;;  %p857_p5 = scmp.ge.s32.totalorder %s1433_s21, 1 }
   0xa   : > { %p1507_p4 = por %p1870_p1, %p43_p0  ;;  %p164_p7 = scmp.lt.s32.totalorder %s1433_s21, 3 }
   0xb   : > { %p1512_p6 = por %p157_p3, %p43_p0  ;;  %s1435_s27 = smov [#allocation5]  }
   0xc   : > { %s1874_s24 = scalar_select %p1507_p4, 1, 0 }
   0xd   : > { %s1875_s25 = scalar_select %p1512_p6, 1, 0 }
   0xe   : > { %p1517_p8 = pnand %p857_p5, %p164_p7  ;;  %s176_s28 = sshll.u32 %s1435_s27, 4  ;;  %s1521_s28 = int_to_ptr.vmem [resolvable:$true] %s176_s28 }
   0xf   : > { %s1436_s30 = smov [#allocation7]   ;;  %s1437_s7 = smov [#allocation8]  }
  0x10   : > { %s1876_s26 = scalar_select %p1517_p8, 1, 0 }
  0x11   : > { %p1165_p9 = pneg %p1517_p8  ;;  %s189_s6 = sshll.u32 %s1436_s30, 4  ;;  %s1532_s6 = int_to_ptr.vmem [resolvable:$true] %s189_s6 }
  0x12   : > { %s1534_s8 = sshll.u32 %s1437_s7, 4  ;;  %s1245_s11 = scalar_lea.hbm %s1865_s1, 2048  ;;  %s203_s8 = int_to_ptr.vmem [resolvable:$true] %s1534_s8 }
  0x13   : > { %p1528_p11 = pnand %p1165_p9, %p1870_p1  ;;  %p1246_p12 = scmp.ne.s32.totalorder %s1865_s1, %s1245_s11 }
  0x14   : > { %p1252_p5 = scmp.lt.u32.totalorder %s1245_s11, %s1865_s1 }
  0x15   : > { %p1544_p13 = pneg %p1528_p11 }
  0x17   : > { %p1248_p0 = pnand %p1544_p13, %p1246_p12 }
  0x19   : > { %p1249_p3 = pneg %p1248_p0 }
  0x1b   : > { %p1254_p7 = pnand %p1252_p5, %p1249_p3 }
  0x1d   : > { %1257 = shalt.err (!%p1254_p7)
}
  0x1e   : > { %s1258_s17 = scalar_lea.vmem %s1521_s28, 2048  ;;  %p1266_p2 = scmp.lt.s32.totalorder %s1521_s28, %s1521_s28 }
  0x1f   : > { %p1259_p9 = scmp.ne.s32.totalorder %s1521_s28, %s1258_s17  ;;  %p1267_p6 = scmp.lt.s32.totalorder %s1258_s17, %s1258_s17 }
  0x21   : > { %p1261_p10 = pnand %p1259_p9, %p1544_p13  ;;  %p1268_p12 = por %p1267_p6, %p1266_p2 }
  0x23   : > { %p1262_p1 = pneg %p1261_p10 }
  0x25   : > { %p1269_p0 = pnand %p1268_p12, %p1262_p1 }
  0x27   : > { %1272 = shalt.err (!%p1269_p0)
}
  0x28   : > { %s1873_s23 = smov 128   ;;  %s1439_s27 = smov 8  }
  0x29   : > { %1168 = dma.hbm_to_vmem [thread:$0]  (!%p1528_p11), %s1865_s1, 2048, %s1521_s28, [#allocation6], %s1873_s23, %s1873_s23, %s1439_s27  }
  0x2a   : > { %s1273_s11 = scalar_lea.hbm %s1866_s2, 2048 }
  0x2b   : > { %p1274_p1 = scmp.ne.s32.totalorder %s1866_s2, %s1273_s11  ;;  %p1280_p10 = scmp.lt.u32.totalorder %s1273_s11, %s1866_s2 }
  0x2d   : > { %p1276_p2 = pnand %p1274_p1, %p1544_p13 }
  0x2f   : > { %p1277_p6 = pneg %p1276_p2 }
  0x31   : > { %p1282_p3 = pnand %p1280_p10, %p1277_p6 }
  0x33   : > { %1285 = shalt.err (!%p1282_p3)
}
  0x34   : > { %s1286_s28 = scalar_lea.vmem %s1532_s6, 2048  ;;  %p1294_p12 = scmp.lt.s32.totalorder %s1532_s6, %s1532_s6 }
  0x35   : > { %p1287_p5 = scmp.ne.s32.totalorder %s1532_s6, %s1286_s28  ;;  %p1295_p0 = scmp.lt.s32.totalorder %s1286_s28, %s1286_s28 }
  0x37   : > { %p1289_p7 = pnand %p1287_p5, %p1544_p13  ;;  %p1296_p1 = por %p1295_p0, %p1294_p12 }
  0x39   : > { %p1290_p9 = pneg %p1289_p7 }
  0x3b   : > { %p1297_p2 = pnand %p1296_p1, %p1290_p9 }
  0x3d   : > { %1300 = shalt.err (!%p1297_p2)
}
  0x3e   : > { %1171 = dma.hbm_to_vmem [thread:$0]  (!%p1528_p11), %s1866_s2, 2048, %s1532_s6, [#allocation6], %s1873_s23, %s1873_s23, %s1439_s27  }
  0x3f   : > { %s1301_s10 = scalar_lea.hbm %s1867_s3, 2048 }
  0x40   : > { %p1302_p6 = scmp.ne.s32.totalorder %s1867_s3, %s1301_s10  ;;  %p1308_p5 = scmp.lt.u32.totalorder %s1301_s10, %s1867_s3 }
  0x42   : > { %p1304_p10 = pnand %p1302_p6, %p1544_p13 }
  0x44   : > { %p1305_p3 = pneg %p1304_p10 }
  0x46   : > { %p1310_p7 = pnand %p1308_p5, %p1305_p3 }
  0x48   : > { %1313 = shalt.err (!%p1310_p7)
}
  0x49   : > { %s1314_s16 = scalar_lea.vmem %s203_s8, 2048  ;;  %p1322_p1 = scmp.lt.s32.totalorder %s203_s8, %s203_s8 }
  0x4a   : > { %p1315_p9 = scmp.ne.s32.totalorder %s203_s8, %s1314_s16  ;;  %p1323_p2 = scmp.lt.s32.totalorder %s1314_s16, %s1314_s16 }
  0x4c   : > { %p1317_p12 = pnand %p1315_p9, %p1544_p13  ;;  %p1324_p4 = por %p1323_p2, %p1322_p1 }
  0x4e   : > { %p1318_p0 = pneg %p1317_p12 }
  0x50   : > { %p1325_p8 = pnand %p1324_p4, %p1318_p0 }
  0x52   : > { %1328 = shalt.err (!%p1325_p8)
}
  0x53   : > { %1174 = dma.hbm_to_vmem [thread:$0]  (!%p1528_p11), %s1867_s3, 2048, %s203_s8, [#allocation9], %s1873_s23, %s1873_s23, %s1439_s27  }
  0x54   : > { %s1617_s14 = sadd.s32 1, %s1433_s21   ;;  %s30_s17 = sadd.s32 1, %s1429_s20 }
  0x55   : > { %s27_s29 = ssub.s32 %s1433_s21, %s1617_s14  ;;  %p37_p8 = scmp.ne.s32.totalorder %s1429_s20, %s1425_s19 }
  0x56   : > { %p28_p4 = scmp.eq.s32.totalorder %s27_s29, 0  ;;  %p38_p13 = scmp.eq.s32.totalorder %s1433_s21, 0 }
  0x57   : > { %p1186_p6 = scmp.lt.s32.totalorder %s1433_s21, 2  ;;  %p1879_p3 = scmp.eq.s32.totalorder %s1498_s22, 1 }
  0x58   : > { %s1627_s30 = scalar_select %p28_p4, %s1429_s20, %s30_s17  }
  0x59   : > { %p39_p10 = por %p38_p13, %p37_p8  ;;  %p1631_p5 = por %p1879_p3, %p37_p8 }
  0x5a   : > { %s219_s9 = sand.u32 1, %s1429_s20   ;;  %s877_s10 = smul.u32 384, %s1433_s21 }
  0x5b   : > { %s1147_s8 = smul.u32 24, %s219_s9  ;;  %p1637_p11 = pnand %p1186_p6, %p39_p10 }
  0x5c   : > { %s1644_s15 = scalar_lea.hbm %s1864_s0, %s877_s10  ;;  %s1648_s28 = scalar_lea.sflag [#allocation3], %s219_s9 }
  0x5d   : > { %s223_s16 = scalar_lea.vmem [#allocation2], %s1147_s8  ;;  %s1329_s29 = scalar_lea.hbm %s1644_s15, 384 }
  0x5e   : > { %s230_s6 = sshll.u32 %s223_s16, 4  ;;  %p1330_p7 = scmp.ne.s32.totalorder %s1644_s15, %s1329_s29  ;;  %s1646_s6 = int_to_ptr.vmem [resolvable:$true] %s230_s6 }
  0x5f   : > { %p1331_p9 = pneg %p1637_p11  ;;  %s1334_s12 = scalar_lea.hbm %s1864_s0, 768 }
  0x60   : > { %p1335_p1 = scmp.lt.u32.totalorder %s1644_s15, %s1864_s0  ;;  %p1336_p2 = scmp.lt.u32.totalorder %s1334_s12, %s1329_s29 }
  0x61   : > { %p1332_p12 = pnand %p1331_p9, %p1330_p7  ;;  %p1338_p8 = scmp.lt.u32.totalorder %s1329_s29, %s1644_s15 }
  0x62   : > { %p1337_p4 = por %p1336_p2, %p1335_p1 }
  0x63   : > { %p1333_p0 = pneg %p1332_p12 }
  0x64   : > { %p1339_p13 = por %p1338_p8, %p1337_p4 }
  0x66   : > { %p1340_p6 = pnand %p1339_p13, %p1333_p0 }
  0x68   : > { %1343 = shalt.err (!%p1340_p6)
}
  0x69   : > { %s1344_s9 = scalar_lea.vmem %s1646_s6, 384  ;;  %s1440_s8 = smov [#allocation2]  }
  0x6a   : > { %p1345_p10 = scmp.ne.s32.totalorder %s1646_s6, %s1344_s9  ;;  %s1349_s16 = sshll.u32 %s1440_s8, 4  ;;  %s1350_s16 = int_to_ptr.vmem [resolvable:$false] %s1349_s16 }
  0x6b   : > { %s1351_s23 = scalar_lea.vmem %s1350_s16, 768  ;;  %p1352_p12 = scmp.lt.s32.totalorder %s1646_s6, %s1350_s16 }
  0x6c   : > { %p1347_p3 = pnand %p1345_p10, %p1331_p9  ;;  %p1353_p1 = scmp.lt.s32.totalorder %s1351_s23, %s1344_s9 }
  0x6e   : > { %p1348_p7 = pneg %p1347_p3  ;;  %p1354_p2 = por %p1353_p1, %p1352_p12 }
  0x70   : > { %p1355_p4 = pnand %p1354_p2, %p1348_p7 }
  0x72   : > { %1358 = shalt.err (!%p1355_p4)
}
  0x73   : > { %s1882_s29 = smov 128   ;;  %p1883_p9 = scmp.ne.s32.totalorder %s1876_s26, 0 }
  0x74   : > { %1178 = dma.hbm_to_vmem [thread:$0]  (!%p1637_p11), %s1644_s15, 384, %s1646_s6, %s1648_s28, %s1882_s29, %s1882_s29, %s1439_s27  }
  0x75   : > { %242 = sbr.rel (%p1883_p9) target bundleno = 1184 (0x4a0), region = 40  ;;  %s1682_s17 = sand.u32 (!%p1883_p9), 1, %s1425_s19  }
  0x76   : > { %s1148_s10 = smul.u32 (!%p1883_p9), 24, %s1682_s17  ;;  %s245_s12 = scalar_lea.sflag (!%p1883_p9), [#allocation3], %s1682_s17 }
  0x77   : > { %p1884_p0 = scmp.ne.s32.totalorder (!%p1883_p9), %s1874_s24, 0 }
  0x78   : > { %s1688_s11 = scalar_lea.vmem (!%p1883_p9), [#allocation2], %s1148_s10 }
  0x7c   : > { %1404 = dma.done.wait (%p1884_p0), %s245_s12, 384  }
  0x7d   : > { %1406 = vsyncadd (%p1884_p0), %s245_s12, 4294966912  ;;  %p1885_p11 = scmp.eq.s32.totalorder %s1498_s22, 0 }
  0x7f   : > { %1408 = dma.done.wait (%p1885_p11), [#allocation6], 4096   ;;  %p1886_p8 = pmov %p1885_p11 }
  0x81   : > { %1410 = vsyncadd (%p1886_p8), [#allocation6], 4294963200  ;;  %p1887_p13 = pmov %p1886_p8 }
  0x82   : > { %p1888_p6 = pmov %p1886_p8 }
  0x83   : > { %1412 = dma.done.wait (%p1887_p13), [#allocation9], 2048  }
  0x84   : > { %1414 = vsyncadd (%p1888_p6), [#allocation9], 4294965248  ;;  %v1441_v0 = vmov 0.0|0.0   ;;  %vm1442_vm0 = vmmov 0   ;;  %v1443_v1 = vmov 0.0   ;;  %v292_v2 = vld [vmem:[#allocation5] sm:$0xff] }
  0x85   : > { %1059 = vmatprep.subr.bf16.mxu0 %v1441_v0  ;;  %968 = vmatprep.mubr.msk.f32.mxu0 %vm1442_vm0, %v1443_v1  ;;  %v293_v3 = vld [vmem:[#allocation5 + $0x8] sm:$0xff]  ;;  %v294_v4 = vld [vmem:[#allocation5 + $0x10] sm:$0xff]  ;;  %v295_v6 = vld [vmem:[#allocation5 + $0x18] sm:$0xff]  ;;  %s286_s24 = scalar_lea.vmem [#allocation10], %s1148_s10  ;;  %s878_s27 = smul.u32 384, %s1498_s22 }
  0x86   : > { %1083 = vmatprep.subr.bf16.mxu1 %v1441_v0  ;;  %1009 = vmatprep.mubr.msk.f32.mxu1 %vm1442_vm0, %v1443_v1  ;;  %v1060_v5 = vpack.c.bf16 %v293_v3, %v292_v2  ;;  %v1063_v7 = vpack.c.bf16 %v295_v6, %v294_v4  ;;  %v296_v8 = vld [vmem:[#allocation5 + $0x20] sm:$0xff]  ;;  %v297_v9 = vld [vmem:[#allocation5 + $0x28] sm:$0xff]  ;;  %v298_v11 = vld [vmem:[#allocation5 + $0x30] sm:$0xff]  ;;  %s754_s26 = sshll.u32 %s286_s24, 4  ;;  %s741_s10 = scalar_lea.sflag [#allocation4], %s1682_s17  ;;  %s1815_s26 = int_to_ptr.vmem [resolvable:$true] %s754_s26 }
  0x87   : > { %v1066_v10 = vpack.c.bf16 %v297_v9, %v296_v8  ;;  %v299_v12 = vld [vmem:[#allocation5 + $0x38] sm:$0xff]  ;;  %v300_v14 = vld [vmem:[#allocation5 + $0x40] sm:$0xff]  ;;  %v301_v15 = vld [vmem:[#allocation5 + $0x48] sm:$0xff]  ;;  %s1820_s28 = scalar_lea.hbm %s1869_s5, %s878_s27  ;;  %s1359_s22 = scalar_lea.vmem %s1815_s26, 384 }
  0x88   : > { %1061 = vmatpush3.bf16.msra.mxu0 %v1060_v5  ;;  %v1069_v13 = vpack.c.bf16 %v299_v12, %v298_v11  ;;  %v1072_v16 = vpack.c.bf16 %v301_v15, %v300_v14  ;;  %v302_v17 = vld [vmem:[#allocation5 + $0x50] sm:$0xff]  ;;  %v303_v18 = vld [vmem:[#allocation5 + $0x58] sm:$0xff]  ;;  %v304_v20 = vld [vmem:[#allocation5 + $0x60] sm:$0xff]  ;;  %p1360_p10 = scmp.ne.s32.totalorder %s1815_s26, %s1359_s22  ;;  %s1444_s13 = smov [#allocation10]  }
  0x89   : > { %1062 = vmatprep.subr.bf16.mxu0 %v1441_v0  ;;  %v1075_v19 = vpack.c.bf16 %v303_v18, %v302_v17  ;;  %v305_v21 = vld [vmem:[#allocation5 + $0x68] sm:$0xff]  ;;  %v306_v23 = vld [vmem:[#allocation5 + $0x70] sm:$0xff]  ;;  %v307_v24 = vld [vmem:[#allocation5 + $0x78] sm:$0xff]  ;;  %s1363_s9 = sshll.u32 %s1444_s13, 4  ;;  %s1364_s9 = int_to_ptr.vmem [resolvable:$false] %s1363_s9 }
  0x8a   : > { %v1078_v22 = vpack.c.bf16 %v305_v21, %v304_v20  ;;  %v1081_v25 = vpack.c.bf16 %v307_v24, %v306_v23  ;;  %v289_v26 = vld [vmem:[%s1688_s11] sm:$0xff]  ;;  %v290_v27 = vld [vmem:[%s1688_s11 + $0x8] sm:$0xff]  ;;  %v291_v28 = vld [vmem:[%s1688_s11 + $0x10] sm:$0xff]  ;;  %p1361_p3 = pnand %p1360_p10, %p1631_p5  ;;  %s1365_s8 = scalar_lea.vmem %s1364_s9, 768 }
  0x8b   : > { %v867_v29 = vld [vmem:[%s1868_s4] ss:$0 sm:$0xff]  ;;  %v463_v42 = vld [vmem:[#allocation7] sm:$0xff]  ;;  %v464_v43 = vld [vmem:[#allocation7 + $0x8] sm:$0xff]  ;;  %p1366_p12 = scmp.lt.s32.totalorder %s1815_s26, %s1364_s9  ;;  %p1367_p1 = scmp.lt.s32.totalorder %s1365_s8, %s1359_s22 }
  0x8c   : > { %1064 = vmatpush3.bf16.msra.mxu0 %v1063_v7  ;;  %v1084_v44 = vpack.c.bf16 %v464_v43, %v463_v42  ;;  %v465_v45 = vld [vmem:[#allocation7 + $0x10] sm:$0xff]  ;;  %v466_v46 = vld [vmem:[#allocation7 + $0x18] sm:$0xff]  ;;  %v467_v48 = vld [vmem:[#allocation7 + $0x20] sm:$0xff]  ;;  %p1362_p7 = pneg %p1361_p3 }
  0x8d   : > { %1065 = vmatprep.subr.bf16.mxu0 %v1441_v0  ;;  %v1087_v47 = vpack.c.bf16 %v466_v46, %v465_v45  ;;  %v468_v49 = vld [vmem:[#allocation7 + $0x28] sm:$0xff]  ;;  %v469_v51 = vld [vmem:[#allocation7 + $0x30] sm:$0xff]  ;;  %v470_v52 = vld [vmem:[#allocation7 + $0x38] sm:$0xff]  ;;  %p1368_p2 = por %p1367_p1, %p1366_p12 }
  0x8e   : > { %1085 = vmatpush3.bf16.msra.mxu1 %v1084_v44  ;;  %v1090_v50 = vpack.c.bf16 %v468_v49, %v467_v48  ;;  %v1093_v53 = vpack.c.bf16 %v470_v52, %v469_v51  ;;  %v471_v54 = vld [vmem:[#allocation7 + $0x40] sm:$0xff]  ;;  %v472_v55 = vld [vmem:[#allocation7 + $0x48] sm:$0xff]  ;;  %v473_v57 = vld [vmem:[#allocation7 + $0x50] sm:$0xff] }
  0x8f   : > { %1086 = vmatprep.subr.bf16.mxu1 %v1441_v0  ;;  %v1096_v56 = vpack.c.bf16 %v472_v55, %v471_v54  ;;  %v474_v58 = vld [vmem:[#allocation7 + $0x58] sm:$0xff]  ;;  %v475_v60 = vld [vmem:[#allocation7 + $0x60] sm:$0xff]  ;;  %v476_v61 = vld [vmem:[#allocation7 + $0x68] sm:$0xff]  ;;  %p1369_p4 = pnand %p1368_p2, %p1362_p7 }
  0x90   : > { %1067 = vmatpush3.bf16.msra.mxu0 %v1066_v10  ;;  %v1099_v59 = vpack.c.bf16 %v474_v58, %v473_v57  ;;  %v1102_v62 = vpack.c.bf16 %v476_v61, %v475_v60  ;;  %v477_v63 = vld [vmem:[#allocation7 + $0x70] sm:$0xff]  ;;  %v478_v2 = vld [vmem:[#allocation7 + $0x78] sm:$0xff] }
  0x91   : > { %1068 = vmatprep.subr.bf16.mxu0 %v1441_v0  ;;  %v1105_v3 = vpack.c.bf16 %v478_v2, %v477_v63  ;;  %v634_v2 = vld [vmem:[#allocation8] sm:$0xff] }
  0x92   : > { %1088 = vmatpush3.bf16.msra.mxu1 %v1087_v47 }
  0x93   : > { %1089 = vmatprep.subr.bf16.mxu1 %v1441_v0 }
  0x94   : > { %1070 = vmatpush3.bf16.msra.mxu0 %v1069_v13 }
  0x95   : > { %1071 = vmatprep.subr.bf16.mxu0 %v1441_v0 }
  0x96   : > { %1091 = vmatpush3.bf16.msra.mxu1 %v1090_v50 }
  0x97   : > { %1092 = vmatprep.subr.bf16.mxu1 %v1441_v0 }
  0x98   : > { %1073 = vmatpush3.bf16.msra.mxu0 %v1072_v16 }
  0x99   : > { %1074 = vmatprep.subr.bf16.mxu0 %v1441_v0 }
  0x9a   : > { %1094 = vmatpush3.bf16.msra.mxu1 %v1093_v53  ;;  %v870_v53 = vld [vmem:[%s1868_s4 + $0x3] ss:$0 sm:$0xff] }
  0x9b   : > { %1095 = vmatprep.subr.bf16.mxu1 %v1441_v0 }
  0x9c   : > { %1076 = vmatpush3.bf16.msra.mxu0 %v1075_v19 }
  0x9d   : > { %1077 = vmatprep.subr.bf16.mxu0 %v1441_v0 }
  0x9e   : > { %1097 = vmatpush3.bf16.msra.mxu1 %v1096_v56 }
  0x9f   : > { %1098 = vmatprep.subr.bf16.mxu1 %v1441_v0 }
  0xa0   : > { %1079 = vmatpush3.bf16.msra.mxu0 %v1078_v22 }
  0xa1   : > { %1080 = vmatprep.subr.bf16.mxu0 %v1441_v0 }
  0xa2   : > { %1100 = vmatpush3.bf16.msra.mxu1 %v1099_v59 }
  0xa3   : > { %1101 = vmatprep.subr.bf16.mxu1 %v1441_v0 }
  0xa4   : > { %1082 = vmatpush3.bf16.msra.mxu0 %v1081_v25 }
  0xa5   : > { %1107 = vmatprep.subr.bf16.mxu0 %v1441_v0 }
  0xa6   : > { %1103 = vmatpush3.bf16.msra.mxu1 %v1102_v62 }
  0xa7   : > { %969 = vmatmul.mubr.f32.vlgmr.msra.gmra.mrb[0].mxu0 %v289_v26  ;;  %1104 = vmatprep.subr.bf16.mxu1 %v1441_v0 }
  0xa8   : > { %971 = vmatprep.mubr.msk.f32.mxu0 %vm1442_vm0, %v1443_v1 }
  0xaa   : > { %1106 = vmatpush3.bf16.msra.mxu1 %v1105_v3  ;;  %v635_v3 = vld [vmem:[#allocation8 + $0x8] sm:$0xff] }
  0xab   : > { %972 = vmatmul.mubr.f32.gmra.mrb[2].mxu0 %v290_v27  ;;  %1131 = vmatprep.subr.bf16.mxu1 %v1441_v0 }
  0xac   : > { %974 = vmatprep.mubr.msk.f32.mxu0 %vm1442_vm0, %v1443_v1 }
  0xaf   : > { %975 = vmatmul.mubr.f32.gmra.mrb[4].mxu0 %v291_v28 }
  0xb0   : > { %1050 = vmatprep.mubr.msk.f32.mxu0 %vm1442_vm0, %v1443_v1 }
 0x17a   : > { %v383_v30 = vpop.f32.mrb[0].mxu0 }
 0x17b   : > { %v1728_v31 = vadd.f32 %v867_v29, %v383_v30  ;;  %v970_v32 = vpop.f32.mrb[1].mxu0  ;;  %v868_v30 = vld [vmem:[%s1868_s4 + $0x1] ss:$0 sm:$0xff] }
 0x17d   : > { %397 = vadd.xlane.f32.xlu0 %v1728_v31  ;;  %v406_v36 = vmul.f32 %v1728_v31, %v1728_v31 }
 0x17e   : > { %v388_v33 = vpop.f32.mrb[2].mxu0 }
 0x17f   : > { %v1731_v34 = vadd.f32 %v867_v29, %v388_v33  ;;  %v973_v35 = vpop.f32.mrb[3].mxu0  ;;  %v869_v33 = vld [vmem:[%s1868_s4 + $0x2] ss:$0 sm:$0xff] }
 0x181   : > { %409 = vadd.xlane.f32.xlu0 %v406_v36  ;;  %399 = vadd.xlane.f32.xlu1 %v1731_v34  ;;  %v407_v39 = vmul.f32 %v1731_v34, %v1731_v34 }
 0x182   : > { %v393_v37 = vpop.f32.mrb[4].mxu0 }
 0x183   : > { %v1736_v38 = vadd.f32 %v867_v29, %v393_v37  ;;  %v976_v40 = vpop.f32.mrb[5].mxu0 }
 0x185   : > { %411 = vadd.xlane.f32.xlu1 %v407_v39  ;;  %401 = vadd.xlane.f32.xlu0 %v1736_v38  ;;  %v408_v41 = vmul.f32 %v1736_v38, %v1736_v38 }
 0x189   : > { %413 = vadd.xlane.f32.xlu1 %v408_v41 }
 0x20a   : > { %v398_v4 = vpop.xlane.xlu0 %397 }
 0x20b   : > { %v403_v5 = vmul.f32 0.015625, %v398_v4  ;;  %v1108_v4 = vpack.c.bf16 %v635_v3, %v634_v2 }
 0x20d   : > { %v418_v8 = vmul.f32 %v403_v5, %v403_v5  ;;  %v427_v28 = vsub.f32 %v1728_v31, %v403_v5  ;;  %1109 = vmatpush3.bf16.msra.mxu0 %v1108_v4  ;;  %v636_v5 = vld [vmem:[#allocation8 + $0x10] sm:$0xff] }
 0x20e   : > { %v410_v6 = vpop.xlane.xlu0 %409  ;;  %v400_v7 = vpop.xlane.xlu1 %399  ;;  %1110 = vmatprep.subr.bf16.mxu0 %v1441_v0 }
 0x20f   : > { %v415_v9 = vmul.f32 0.015625, %v410_v6  ;;  %v404_v10 = vmul.f32 0.015625, %v400_v7  ;;  %v637_v6 = vld [vmem:[#allocation8 + $0x18] sm:$0xff] }
 0x210   : > { %v1111_v7 = vpack.c.bf16 %v637_v6, %v636_v5 }
 0x211   : > { %v421_v11 = vsub.f32 %v415_v9, %v418_v8  ;;  %v419_v15 = vmul.f32 %v404_v10, %v404_v10  ;;  %v428_v35 = vsub.f32 %v1731_v34, %v404_v10  ;;  %v638_v8 = vld [vmem:[#allocation8 + $0x20] sm:$0xff]  ;;  %v639_v9 = vld [vmem:[#allocation8 + $0x28] sm:$0xff] }
 0x212   : > { %v412_v12 = vpop.xlane.xlu1 %411  ;;  %v402_v13 = vpop.xlane.xlu0 %401  ;;  %1112 = vmatpush3.bf16.msra.mxu0 %v1111_v7  ;;  %v1114_v10 = vpack.c.bf16 %v639_v9, %v638_v8 }
 0x213   : > { %v424_v14 = vmax.f32 %v421_v11, 0.0  ;;  %v416_v16 = vmul.f32 0.015625, %v412_v12  ;;  %v405_v17 = vmul.f32 0.015625, %v402_v13  ;;  %1113 = vmatprep.subr.bf16.mxu0 %v1441_v0  ;;  %v640_v11 = vld [vmem:[#allocation8 + $0x30] sm:$0xff]  ;;  %v641_v12 = vld [vmem:[#allocation8 + $0x38] sm:$0xff] }
 0x214   : > { %v1117_v13 = vpack.c.bf16 %v641_v12, %v640_v11 }
 0x215   : > { %v430_v18 = vadd.f32 1e-05, %v424_v14  ;;  %v422_v19 = vsub.f32 %v416_v16, %v419_v15  ;;  %v420_v20 = vmul.f32 %v405_v17, %v405_v17  ;;  %v429_v41 = vsub.f32 %v1736_v38, %v405_v17  ;;  %v642_v14 = vld [vmem:[#allocation8 + $0x40] sm:$0xff]  ;;  %v643_v15 = vld [vmem:[#allocation8 + $0x48] sm:$0xff]  ;;  %v644_v17 = vld [vmem:[#allocation8 + $0x50] sm:$0xff] }
 0x216   : > { %v414_v21 = vpop.xlane.xlu1 %413  ;;  %1115 = vmatpush3.bf16.msra.mxu0 %v1114_v10  ;;  %v1120_v16 = vpack.c.bf16 %v643_v15, %v642_v14 }
 0x217   : > { %1233 = vrsqrt.f32 %v430_v18  ;;  %v425_v22 = vmax.f32 %v422_v19, 0.0  ;;  %v417_v23 = vmul.f32 0.015625, %v414_v21  ;;  %1116 = vmatprep.subr.bf16.mxu0 %v1441_v0  ;;  %v645_v18 = vld [vmem:[#allocation8 + $0x58] sm:$0xff]  ;;  %v647_v21 = vld [vmem:[#allocation8 + $0x68] sm:$0xff] }
 0x218   : > { %v1123_v19 = vpack.c.bf16 %v645_v18, %v644_v17 }
 0x219   : > { %v431_v24 = vadd.f32 1e-05, %v425_v22  ;;  %v423_v25 = vsub.f32 %v417_v23, %v420_v20  ;;  %v646_v20 = vld [vmem:[#allocation8 + $0x60] sm:$0xff]  ;;  %v648_v23 = vld [vmem:[#allocation8 + $0x70] sm:$0xff] }
 0x21a   : > { %1118 = vmatpush3.bf16.msra.mxu0 %v1117_v13  ;;  %v1126_v22 = vpack.c.bf16 %v647_v21, %v646_v20 }
 0x21b   : > { %1235 = vrsqrt.f32 %v431_v24  ;;  %v426_v26 = vmax.f32 %v423_v25, 0.0  ;;  %1119 = vmatprep.subr.bf16.mxu0 %v1441_v0  ;;  %v649_v24 = vld [vmem:[#allocation8 + $0x78] sm:$0xff] }
 0x21c   : > { %v1129_v25 = vpack.c.bf16 %v649_v24, %v648_v23 }
 0x21d   : > { %v432_v27 = vadd.f32 1e-05, %v426_v26 }
 0x21e   : > { %1121 = vmatpush3.bf16.msra.mxu0 %v1120_v16 }
 0x21f   : > { %1237 = vrsqrt.f32 %v432_v27  ;;  %1122 = vmatprep.subr.bf16.mxu0 %v1441_v0 }
 0x221   : > { %v1234_v29 = vpop.eup %1233 }
 0x222   : > { %v436_v32 = vmul.f32 %v1234_v29, %v427_v28  ;;  %1124 = vmatpush3.bf16.msra.mxu0 %v1123_v19 }
 0x223   : > { %1125 = vmatprep.subr.bf16.mxu0 %v1441_v0 }
 0x224   : > { %v445_v36 = vmul.f32 %v868_v30, %v436_v32 }
 0x225   : > { %v1236_v37 = vpop.eup %1235 }
 0x226   : > { %v454_v39 = vadd.f32 %v869_v33, %v445_v36  ;;  %v437_v40 = vmul.f32 %v1236_v37, %v428_v35  ;;  %1127 = vmatpush3.bf16.msra.mxu0 %v1126_v22 }
 0x227   : > { %1128 = vmatprep.subr.bf16.mxu0 %v1441_v0 }
 0x228   : > { %v457_v42 = vmul.f32 0.2, %v454_v39  ;;  %v446_v31 = vmul.f32 %v868_v30, %v437_v40 }
 0x229   : > { %v1238_v43 = vpop.eup %1237 }
 0x22a   : > { %v460_v44 = vmax.f32 %v454_v39, %v457_v42  ;;  %v455_v45 = vadd.f32 %v869_v33, %v446_v31  ;;  %v438_v46 = vmul.f32 %v1238_v43, %v429_v41  ;;  %1130 = vmatpush3.bf16.msra.mxu0 %v1129_v25 }
 0x22c   : > { %1010 = vmatmul.mubr.f32.vlgmr.msra.gmra.mrb[0].mxu1 %v460_v44  ;;  %v458_v47 = vmul.f32 0.2, %v455_v45  ;;  %v447_v48 = vmul.f32 %v868_v30, %v438_v46 }
 0x22d   : > { %1012 = vmatprep.mubr.msk.f32.mxu1 %vm1442_vm0, %v1443_v1  ;;  %1139 = vmatpush3.bf16.msra.mxu1 %v1108_v4 }
 0x22e   : > { %v461_v49 = vmax.f32 %v455_v45, %v458_v47  ;;  %v456_v34 = vadd.f32 %v869_v33, %v447_v48  ;;  %1132 = vmatprep.subr.bf16.mxu1 %v1441_v0 }
 0x230   : > { %1013 = vmatmul.mubr.f32.gmra.mrb[2].mxu1 %v461_v49  ;;  %v459_v50 = vmul.f32 0.2, %v456_v34 }
 0x231   : > { %1015 = vmatprep.mubr.msk.f32.mxu1 %vm1442_vm0, %v1443_v1  ;;  %1140 = vmatpush3.bf16.msra.mxu1 %v1111_v7 }
 0x232   : > { %v462_v38 = vmax.f32 %v456_v34, %v459_v50  ;;  %1133 = vmatprep.subr.bf16.mxu1 %v1441_v0 }
 0x234   : > { %1016 = vmatmul.mubr.f32.gmra.mrb[4].mxu1 %v462_v38 }
 0x235   : > { %1053 = vmatprep.mubr.msk.f32.mxu1 %vm1442_vm0, %v1443_v1  ;;  %1141 = vmatpush3.bf16.msra.mxu1 %v1114_v10  ;;  %v873_v10 = vld [vmem:[%s1868_s4 + $0x6] ss:$0 sm:$0xff] }
 0x236   : > { %1134 = vmatprep.subr.bf16.mxu1 %v1441_v0 }
 0x239   : > { %1142 = vmatpush3.bf16.msra.mxu1 %v1117_v13 }
 0x23a   : > { %1135 = vmatprep.subr.bf16.mxu1 %v1441_v0 }
 0x23d   : > { %1143 = vmatpush3.bf16.msra.mxu1 %v1120_v16 }
 0x23e   : > { %1136 = vmatprep.subr.bf16.mxu1 %v1441_v0 }
 0x241   : > { %1144 = vmatpush3.bf16.msra.mxu1 %v1123_v19 }
 0x242   : > { %1137 = vmatprep.subr.bf16.mxu1 %v1441_v0 }
 0x245   : > { %1145 = vmatpush3.bf16.msra.mxu1 %v1126_v22 }
 0x246   : > { %1138 = vmatprep.subr.bf16.mxu1 %v1441_v0 }
 0x249   : > { %1146 = vmatpush3.bf16.msra.mxu1 %v1129_v25 }
 0x2ff   : > { %v554_v51 = vpop.f32.mrb[0].mxu1 }
 0x300   : > { %v1011_v52 = vpop.f32.mrb[1].mxu1  ;;  %v1774_v59 = vadd.f32 %v870_v53, %v554_v51  ;;  %v871_v51 = vld [vmem:[%s1868_s4 + $0x4] ss:$0 sm:$0xff] }
 0x302   : > { %v577_v62 = vmul.f32 %v1774_v59, %v1774_v59 }
 0x303   : > { %v559_v54 = vpop.f32.mrb[2].mxu1 }
 0x304   : > { %v1769_v55 = vadd.f32 %v870_v53, %v559_v54  ;;  %v1014_v56 = vpop.f32.mrb[3].mxu1 }
 0x306   : > { %570 = vadd.xlane.f32.xlu0 %v1769_v55  ;;  %v578_v57 = vmul.f32 %v1769_v55, %v1769_v55 }
 0x307   : > { %v564_v58 = vpop.f32.mrb[4].mxu1 }
 0x308   : > { %582 = vadd.xlane.f32.xlu1 %v578_v57  ;;  %v1017_v60 = vpop.f32.mrb[5].mxu1  ;;  %v1776_v61 = vadd.f32 %v870_v53, %v564_v58  ;;  %v872_v53 = vld [vmem:[%s1868_s4 + $0x5] ss:$0 sm:$0xff] }
 0x30a   : > { %568 = vadd.xlane.f32.xlu0 %v1774_v59  ;;  %v579_v63 = vmul.f32 %v1776_v61, %v1776_v61 }
 0x30c   : > { %572 = vadd.xlane.f32.xlu1 %v1776_v61 }
 0x30e   : > { %580 = vadd.xlane.f32.xlu0 %v577_v62 }
 0x310   : > { %584 = vadd.xlane.f32.xlu1 %v579_v63 }
 0x393   : > { %v571_v26 = vpop.xlane.xlu0 %570 }
 0x394   : > { %v575_v27 = vmul.f32 0.03125, %v571_v26 }
 0x395   : > { %v583_v28 = vpop.xlane.xlu1 %582 }
 0x396   : > { %v590_v29 = vmul.f32 %v575_v27, %v575_v27  ;;  %v587_v30 = vmul.f32 0.03125, %v583_v28  ;;  %v599_v50 = vsub.f32 %v1769_v55, %v575_v27 }
 0x397   : > { %v569_v32 = vpop.xlane.xlu0 %568 }
 0x398   : > { %v593_v33 = vsub.f32 %v587_v30, %v590_v29  ;;  %v574_v35 = vmul.f32 0.03125, %v569_v32 }
 0x399   : > { %v573_v36 = vpop.xlane.xlu1 %572 }
 0x39a   : > { %v596_v37 = vmax.f32 %v593_v33, 0.0  ;;  %v576_v39 = vmul.f32 0.03125, %v573_v36  ;;  %v589_v42 = vmul.f32 %v574_v35, %v574_v35  ;;  %v598_v56 = vsub.f32 %v1774_v59, %v574_v35 }
 0x39b   : > { %v581_v40 = vpop.xlane.xlu0 %580 }
 0x39c   : > { %v602_v41 = vadd.f32 1e-05, %v596_v37  ;;  %v586_v31 = vmul.f32 0.03125, %v581_v40  ;;  %v591_v0 = vmul.f32 %v576_v39, %v576_v39  ;;  %v600_v60 = vsub.f32 %v1776_v61, %v576_v39 }
 0x39d   : > { %v585_v43 = vpop.xlane.xlu1 %584 }
 0x39e   : > { %1239 = vrsqrt.f32 %v602_v41  ;;  %v592_v44 = vsub.f32 %v586_v31, %v589_v42  ;;  %v588_v45 = vmul.f32 0.03125, %v585_v43 }
 0x3a0   : > { %v595_v46 = vmax.f32 %v592_v44, 0.0  ;;  %v594_v47 = vsub.f32 %v588_v45, %v591_v0 }
 0x3a2   : > { %v601_v48 = vadd.f32 1e-05, %v595_v46  ;;  %v597_v49 = vmax.f32 %v594_v47, 0.0 }
 0x3a4   : > { %1241 = vrsqrt.f32 %v601_v48  ;;  %v603_v34 = vadd.f32 1e-05, %v597_v49 }
 0x3a6   : > { %1243 = vrsqrt.f32 %v603_v34 }
 0x3a8   : > { %v1240_v38 = vpop.eup %1239 }
 0x3a9   : > { %v608_v52 = vmul.f32 %v1240_v38, %v599_v50 }
 0x3ab   : > { %v617_v54 = vmul.f32 %v871_v51, %v608_v52 }
 0x3ad   : > { %v626_v57 = vadd.f32 %v872_v53, %v617_v54 }
 0x3ae   : > { %v1242_v58 = vpop.eup %1241 }
 0x3af   : > { %v607_v62 = vmul.f32 %v1242_v58, %v598_v56  ;;  %v629_v63 = vmul.f32 0.2, %v626_v57 }
 0x3b0   : > { %v1244_v55 = vpop.eup %1243 }
 0x3b1   : > { %v632_v2 = vmax.f32 %v626_v57, %v629_v63  ;;  %v616_v3 = vmul.f32 %v871_v51, %v607_v62  ;;  %v609_v4 = vmul.f32 %v1244_v55, %v600_v60 }
 0x3b3   : > { %1054 = vmatmul.mubr.f32.vlgmr.msra.gmra.mrb[6].mxu1 %v632_v2  ;;  %v625_v5 = vadd.f32 %v872_v53, %v616_v3  ;;  %v618_v6 = vmul.f32 %v871_v51, %v609_v4 }
 0x3b4   : > { %1056 = vmatprep.mubr.msk.f32.mxu1 %vm1442_vm0, %v1443_v1 }
 0x3b5   : > { %v628_v7 = vmul.f32 0.2, %v625_v5  ;;  %v627_v59 = vadd.f32 %v872_v53, %v618_v6 }
 0x3b7   : > { %v631_v8 = vmax.f32 %v625_v5, %v628_v7  ;;  %v630_v9 = vmul.f32 0.2, %v627_v59 }
 0x3b9   : > { %1051 = vmatmul.mubr.f32.vlgmr.msra.gmra.mrb[6].mxu0 %v631_v8  ;;  %v633_v61 = vmax.f32 %v627_v59, %v630_v9 }
 0x3bb   : > { %1057 = vmatmul.mubr.f32.gmra.mrb[8].mxu1 %v633_v61 }
 0x486   : > { %v728_v11 = vpop.f32.mrb[6].mxu1 }
 0x487   : > { %v729_v12 = vadd.f32 %v873_v10, %v728_v11  ;;  %v1055_v13 = vpop.f32.mrb[7].mxu1 }
 0x489   : > { %738 = vst [vmem:[%s286_s24 + $0x8] sm:$0xff] %v729_v12 }
 0x48c   : > { %v723_v1 = vpop.f32.mrb[6].mxu0 }
 0x48d   : > { %v724_v14 = vadd.f32 %v873_v10, %v723_v1  ;;  %v1052_v15 = vpop.f32.mrb[7].mxu0 }
 0x48e   : > { %v733_v16 = vpop.f32.mrb[8].mxu1 }
 0x48f   : > { %737 = vst [vmem:[%s286_s24] sm:$0xff] %v724_v14  ;;  %v734_v17 = vadd.f32 %v873_v10, %v733_v16  ;;  %v1058_v18 = vpop.f32.mrb[9].mxu1 }
 0x491   : > { %739 = vst [vmem:[%s286_s24 + $0x10] sm:$0xff] %v734_v17 }
 0x492   : > { %1372 = shalt.err (!%p1369_p4)
}
 0x493   : > { %s1373_s16 = scalar_lea.hbm %s1820_s28, 384  ;;  %s1377_s12 = scalar_lea.hbm %s1869_s5, 768 }
 0x494   : > { %p1374_p9 = scmp.ne.s32.totalorder %s1820_s28, %s1373_s16  ;;  %p1378_p8 = scmp.lt.u32.totalorder %s1820_s28, %s1869_s5 }
 0x495   : > { %p1379_p13 = scmp.lt.u32.totalorder %s1377_s12, %s1373_s16  ;;  %p1381_p10 = scmp.lt.u32.totalorder %s1373_s16, %s1820_s28 }
 0x496   : > { %p1375_p0 = pnand %p1374_p9, %p1631_p5 }
 0x497   : > { %p1380_p6 = por %p1379_p13, %p1378_p8 }
 0x498   : > { %p1376_p11 = pneg %p1375_p0 }
 0x499   : > { %p1382_p3 = por %p1381_p10, %p1380_p6 }
 0x49b   : > { %p1383_p7 = pnand %p1382_p3, %p1376_p11 }
 0x49d   : > { %1386 = shalt.err (!%p1383_p7)
}
 0x49e   : > { %s1445_s27 = smov 128   ;;  %s1446_s15 = smov 8  }
 0x49f   : > { %1163 = dma.vmem_to_hbm [thread:$0]  (%p1631_p5), %s1815_s26, 384, %s1820_s28, %s741_s10, %s1445_s27, %s1445_s27, %s1446_s15  }
 0x4a0 PF: > { %s769_s6 = sand.u32 1, %s1421_s18   ;;  %p1889_p12 = scmp.ne.s32.totalorder %s1875_s25, 0 }
 0x4a1   : > { %p1890_p1 = scmp.ge.s32.totalorder %s1433_s21, 2  ;;  %s770_s22 = scalar_lea.sflag [#allocation4], %s769_s6 }
 0x4a3   : > { %p1180_p2 = pnand %p1890_p1, %p1889_p12 }
 0x4a5   : > { %1416 = dma.done.wait (!%p1180_p2), %s770_s22, 384  }
 0x4a6   : > { %1418 = vsyncadd (!%p1180_p2), %s770_s22, 4294966912  ;;  %p20_p4 = scmp.ge.s32.totalorder %s1617_s14, 4   ;;  %s1891_s18 = smov %s1425_s19 }
 0x4a7   : > { %s1892_s19 = smov %s1429_s20  ;;  %s1893_s20 = smov %s1627_s30 }
 0x4a8   : > { %s1894_s21 = smov %s1617_s14  ;;  %22 = sbr.rel (!%p20_p4) target bundleno = 7 (0x7), region = 97 }
 0x4af   :  { %775 = vsyncpa [#allocation3], 1 }
 0x4b0   :  { %777 = vsyncpa [#allocation3 + $0x1], 1 }
 0x4b1   :  { %778 = vsyncpa [#allocation6], 1 }
 0x4b2   :  { %779 = vsyncpa [#allocation9], 1 }
 0x4b3   :  { %780 = vsyncpa [#allocation4], 1 }
 0x4b4   :  { %782 = vsyncpa [#allocation4 + $0x1], 1 }

// kernel: tpu_custom_call.1
= control target key start
LH: loop header
LB: loop body
LE: loop exit
PB: predicated region body
PF: predicated region fallthrough
CT: control target
= control target key end

     0   :  { %10 = vsyncpa [#allocation3], 0  ;;  %s1864_s0 = inlined_call_operand.hbm [shape: f32[48,128], index: 0, kind: input, shape index: {}]   ;;  %s1865_s1 = inlined_call_operand.hbm [shape: f32[128,128], index: 1, kind: input, shape index: {}]   ;;  %s1866_s2 = inlined_call_operand.hbm [shape: f32[128,128], index: 2, kind: input, shape index: {}]   ;;  %s1867_s3 = inlined_call_operand.hbm [shape: f32[128,128], index: 3, kind: input, shape index: {}]   ;;  %s1868_s4 = inlined_call_operand.vmem [shape: f32[1,896], index: 4, kind: input, shape index: {}]   ;;  %s1869_s5 = inlined_call_operand.hbm [shape: f32[48,128], index: 5, kind: output, shape index: {}]  }
   0x1   :  { %12 = vsyncpa [#allocation3 + $0x1], 0 }
   0x2   :  { %13 = vsyncpa [#allocation6], 0 }
   0x3   :  { %14 = vsyncpa [#allocation9], 0 }
   0x4   :  { %15 = vsyncpa [#allocation4], 0 }
   0x5   :  { %17 = vsyncpa [#allocation4 + $0x1], 0  ;;  %s1477_s18 = smov 0   ;;  %s1479_s19 = smov 0  }
   0x6   :  { %s1481_s20 = smov 0   ;;  %s1483_s21 = smov 0  }
   0x7 LB: > { %s1498_s22 = sadd.s32 4294967295, %s1433_s21   ;;  %s856_s23 = sadd.s32 4294967294, %s1433_s21   ;;  %s1433_s21 = sphi %s1483_s21, %s1894_s21   ;;  %s1429_s20 = sphi %s1481_s20, %s1893_s20   ;;  %s1425_s19 = sphi %s1479_s19, %s1892_s19   ;;  %s1421_s18 = sphi %s1477_s18, %s1891_s18  }
   0x8   : > { %p43_p0 = scmp.ne.s32.totalorder %s1425_s19, %s1421_s18  ;;  %p1870_p1 = scmp.eq.s32.totalorder %s1498_s22, 0 }
   0x9   : > { %p157_p3 = scmp.eq.s32.totalorder %s856_s23, 1  ;;  %p857_p5 = scmp.ge.s32.totalorder %s1433_s21, 1 }
   0xa   : > { %p1507_p4 = por %p1870_p1, %p43_p0  ;;  %p164_p7 = scmp.lt.s32.totalorder %s1433_s21, 3 }
   0xb   : > { %p1512_p6 = por %p157_p3, %p43_p0  ;;  %s1435_s27 = smov [#allocation5]  }
   0xc   : > { %s1874_s24 = scalar_select %p1507_p4, 1, 0 }
   0xd   : > { %s1875_s25 = scalar_select %p1512_p6, 1, 0 }
   0xe   : > { %p1517_p8 = pnand %p857_p5, %p164_p7  ;;  %s176_s28 = sshll.u32 %s1435_s27, 4  ;;  %s1521_s28 = int_to_ptr.vmem [resolvable:$true] %s176_s28 }
   0xf   : > { %s1436_s30 = smov [#allocation7]   ;;  %s1437_s7 = smov [#allocation8]  }
  0x10   : > { %s1876_s26 = scalar_select %p1517_p8, 1, 0 }
  0x11   : > { %p1165_p9 = pneg %p1517_p8  ;;  %s189_s6 = sshll.u32 %s1436_s30, 4  ;;  %s1532_s6 = int_to_ptr.vmem [resolvable:$true] %s189_s6 }
  0x12   : > { %s1534_s8 = sshll.u32 %s1437_s7, 4  ;;  %s1245_s11 = scalar_lea.hbm %s1865_s1, 2048  ;;  %s203_s8 = int_to_ptr.vmem [resolvable:$true] %s1534_s8 }
  0x13   : > { %p1528_p11 = pnand %p1165_p9, %p1870_p1  ;;  %p1246_p12 = scmp.ne.s32.totalorder %s1865_s1, %s1245_s11 }
  0x14   : > { %p1252_p5 = scmp.lt.u32.totalorder %s1245_s11, %s1865_s1 }
  0x15   : > { %p1544_p13 = pneg %p1528_p11 }
  0x17   : > { %p1248_p0 = pnand %p1544_p13, %p1246_p12 }
  0x19   : > { %p1249_p3 = pneg %p1248_p0 }
  0x1b   : > { %p1254_p7 = pnand %p1252_p5, %p1249_p3 }
  0x1d   : > { %1257 = shalt.err (!%p1254_p7)
}
  0x1e   : > { %s1258_s17 = scalar_lea.vmem %s1521_s28, 2048  ;;  %p1266_p2 = scmp.lt.s32.totalorder %s1521_s28, %s1521_s28 }
  0x1f   : > { %p1259_p9 = scmp.ne.s32.totalorder %s1521_s28, %s1258_s17  ;;  %p1267_p6 = scmp.lt.s32.totalorder %s1258_s17, %s1258_s17 }
  0x21   : > { %p1261_p10 = pnand %p1259_p9, %p1544_p13  ;;  %p1268_p12 = por %p1267_p6, %p1266_p2 }
  0x23   : > { %p1262_p1 = pneg %p1261_p10 }
  0x25   : > { %p1269_p0 = pnand %p1268_p12, %p1262_p1 }
  0x27   : > { %1272 = shalt.err (!%p1269_p0)
}
  0x28   : > { %s1873_s23 = smov 128   ;;  %s1439_s27 = smov 8  }
  0x29   : > { %1168 = dma.hbm_to_vmem [thread:$0]  (!%p1528_p11), %s1865_s1, 2048, %s1521_s28, [#allocation6], %s1873_s23, %s1873_s23, %s1439_s27  }
  0x2a   : > { %s1273_s11 = scalar_lea.hbm %s1866_s2, 2048 }
  0x2b   : > { %p1274_p1 = scmp.ne.s32.totalorder %s1866_s2, %s1273_s11  ;;  %p1280_p10 = scmp.lt.u32.totalorder %s1273_s11, %s1866_s2 }
  0x2d   : > { %p1276_p2 = pnand %p1274_p1, %p1544_p13 }
  0x2f   : > { %p1277_p6 = pneg %p1276_p2 }
  0x31   : > { %p1282_p3 = pnand %p1280_p10, %p1277_p6 }
  0x33   : > { %1285 = shalt.err (!%p1282_p3)
}
  0x34   : > { %s1286_s28 = scalar_lea.vmem %s1532_s6, 2048  ;;  %p1294_p12 = scmp.lt.s32.totalorder %s1532_s6, %s1532_s6 }
  0x35   : > { %p1287_p5 = scmp.ne.s32.totalorder %s1532_s6, %s1286_s28  ;;  %p1295_p0 = scmp.lt.s32.totalorder %s1286_s28, %s1286_s28 }
  0x37   : > { %p1289_p7 = pnand %p1287_p5, %p1544_p13  ;;  %p1296_p1 = por %p1295_p0, %p1294_p12 }
  0x39   : > { %p1290_p9 = pneg %p1289_p7 }
  0x3b   : > { %p1297_p2 = pnand %p1296_p1, %p1290_p9 }
  0x3d   : > { %1300 = shalt.err (!%p1297_p2)
}
  0x3e   : > { %1171 = dma.hbm_to_vmem [thread:$0]  (!%p1528_p11), %s1866_s2, 2048, %s1532_s6, [#allocation6], %s1873_s23, %s1873_s23, %s1439_s27  }
  0x3f   : > { %s1301_s10 = scalar_lea.hbm %s1867_s3, 2048 }
  0x40   : > { %p1302_p6 = scmp.ne.s32.totalorder %s1867_s3, %s1301_s10  ;;  %p1308_p5 = scmp.lt.u32.totalorder %s1301_s10, %s1867_s3 }
  0x42   : > { %p1304_p10 = pnand %p1302_p6, %p1544_p13 }
  0x44   : > { %p1305_p3 = pneg %p1304_p10 }
  0x46   : > { %p1310_p7 = pnand %p1308_p5, %p1305_p3 }
  0x48   : > { %1313 = shalt.err (!%p1310_p7)
}
  0x49   : > { %s1314_s16 = scalar_lea.vmem %s203_s8, 2048  ;;  %p1322_p1 = scmp.lt.s32.totalorder %s203_s8, %s203_s8 }
  0x4a   : > { %p1315_p9 = scmp.ne.s32.totalorder %s203_s8, %s1314_s16  ;;  %p1323_p2 = scmp.lt.s32.totalorder %s1314_s16, %s1314_s16 }
  0x4c   : > { %p1317_p12 = pnand %p1315_p9, %p1544_p13  ;;  %p1324_p4 = por %p1323_p2, %p1322_p1 }
  0x4e   : > { %p1318_p0 = pneg %p1317_p12 }
  0x50   : > { %p1325_p8 = pnand %p1324_p4, %p1318_p0 }
  0x52   : > { %1328 = shalt.err (!%p1325_p8)
}
  0x53   : > { %1174 = dma.hbm_to_vmem [thread:$0]  (!%p1528_p11), %s1867_s3, 2048, %s203_s8, [#allocation9], %s1873_s23, %s1873_s23, %s1439_s27  }
  0x54   : > { %s1617_s14 = sadd.s32 1, %s1433_s21   ;;  %s30_s17 = sadd.s32 1, %s1429_s20 }
  0x55   : > { %s27_s29 = ssub.s32 %s1433_s21, %s1617_s14  ;;  %p37_p8 = scmp.ne.s32.totalorder %s1429_s20, %s1425_s19 }
  0x56   : > { %p28_p4 = scmp.eq.s32.totalorder %s27_s29, 0  ;;  %p38_p13 = scmp.eq.s32.totalorder %s1433_s21, 0 }
  0x57   : > { %p1186_p6 = scmp.lt.s32.totalorder %s1433_s21, 2  ;;  %p1879_p3 = scmp.eq.s32.totalorder %s1498_s22, 1 }
  0x58   : > { %s1627_s30 = scalar_select %p28_p4, %s1429_s20, %s30_s17  }
  0x59   : > { %p39_p10 = por %p38_p13, %p37_p8  ;;  %p1631_p5 = por %p1879_p3, %p37_p8 }
  0x5a   : > { %s219_s9 = sand.u32 1, %s1429_s20   ;;  %s877_s10 = smul.u32 384, %s1433_s21 }
  0x5b   : > { %s1147_s8 = smul.u32 24, %s219_s9  ;;  %p1637_p11 = pnand %p1186_p6, %p39_p10 }
  0x5c   : > { %s1644_s15 = scalar_lea.hbm %s1864_s0, %s877_s10  ;;  %s1648_s28 = scalar_lea.sflag [#allocation3], %s219_s9 }
  0x5d   : > { %s223_s16 = scalar_lea.vmem [#allocation2], %s1147_s8  ;;  %s1329_s29 = scalar_lea.hbm %s1644_s15, 384 }
  0x5e   : > { %s230_s6 = sshll.u32 %s223_s16, 4  ;;  %p1330_p7 = scmp.ne.s32.totalorder %s1644_s15, %s1329_s29  ;;  %s1646_s6 = int_to_ptr.vmem [resolvable:$true] %s230_s6 }
  0x5f   : > { %p1331_p9 = pneg %p1637_p11  ;;  %s1334_s12 = scalar_lea.hbm %s1864_s0, 768 }
  0x60   : > { %p1335_p1 = scmp.lt.u32.totalorder %s1644_s15, %s1864_s0  ;;  %p1336_p2 = scmp.lt.u32.totalorder %s1334_s12, %s1329_s29 }
  0x61   : > { %p1332_p12 = pnand %p1331_p9, %p1330_p7  ;;  %p1338_p8 = scmp.lt.u32.totalorder %s1329_s29, %s1644_s15 }
  0x62   : > { %p1337_p4 = por %p1336_p2, %p1335_p1 }
  0x63   : > { %p1333_p0 = pneg %p1332_p12 }
  0x64   : > { %p1339_p13 = por %p1338_p8, %p1337_p4 }
  0x66   : > { %p1340_p6 = pnand %p1339_p13, %p1333_p0 }
  0x68   : > { %1343 = shalt.err (!%p1340_p6)
}
  0x69   : > { %s1344_s9 = scalar_lea.vmem %s1646_s6, 384  ;;  %s1440_s8 = smov [#allocation2]  }
  0x6a   : > { %p1345_p10 = scmp.ne.s32.totalorder %s1646_s6, %s1344_s9  ;;  %s1349_s16 = sshll.u32 %s1440_s8, 4  ;;  %s1350_s16 = int_to_ptr.vmem [resolvable:$false] %s1349_s16 }
  0x6b   : > { %s1351_s23 = scalar_lea.vmem %s1350_s16, 768  ;;  %p1352_p12 = scmp.lt.s32.totalorder %s1646_s6, %s1350_s16 }
  0x6c   : > { %p1347_p3 = pnand %p1345_p10, %p1331_p9  ;;  %p1353_p1 = scmp.lt.s32.totalorder %s1351_s23, %s1344_s9 }
  0x6e   : > { %p1348_p7 = pneg %p1347_p3  ;;  %p1354_p2 = por %p1353_p1, %p1352_p12 }
  0x70   : > { %p1355_p4 = pnand %p1354_p2, %p1348_p7 }
  0x72   : > { %1358 = shalt.err (!%p1355_p4)
}
  0x73   : > { %s1882_s29 = smov 128   ;;  %p1883_p9 = scmp.ne.s32.totalorder %s1876_s26, 0 }
  0x74   : > { %1178 = dma.hbm_to_vmem [thread:$0]  (!%p1637_p11), %s1644_s15, 384, %s1646_s6, %s1648_s28, %s1882_s29, %s1882_s29, %s1439_s27  }
  0x75   : > { %242 = sbr.rel (%p1883_p9) target bundleno = 1184 (0x4a0), region = 40  ;;  %s1682_s17 = sand.u32 (!%p1883_p9), 1, %s1425_s19  }
  0x76   : > { %s1148_s10 = smul.u32 (!%p1883_p9), 24, %s1682_s17  ;;  %s245_s12 = scalar_lea.sflag (!%p1883_p9), [#allocation3], %s1682_s17 }
  0x77   : > { %p1884_p0 = scmp.ne.s32.totalorder (!%p1883_p9), %s1874_s24, 0 }
  0x78   : > { %s1688_s11 = scalar_lea.vmem (!%p1883_p9), [#allocation2], %s1148_s10 }
  0x7c   : > { %1404 = dma.done.wait (%p1884_p0), %s245_s12, 384  }
  0x7d   : > { %1406 = vsyncadd (%p1884_p0), %s245_s12, 4294966912  ;;  %p1885_p11 = scmp.eq.s32.totalorder %s1498_s22, 0 }
  0x7f   : > { %1408 = dma.done.wait (%p1885_p11), [#allocation6], 4096   ;;  %p1886_p8 = pmov %p1885_p11 }
  0x81   : > { %1410 = vsyncadd (%p1886_p8), [#allocation6], 4294963200  ;;  %p1887_p13 = pmov %p1886_p8 }
  0x82   : > { %p1888_p6 = pmov %p1886_p8 }
  0x83   : > { %1412 = dma.done.wait (%p1887_p13), [#allocation9], 2048  }
  0x84   : > { %1414 = vsyncadd (%p1888_p6), [#allocation9], 4294965248  ;;  %v1441_v0 = vmov 0.0|0.0   ;;  %vm1442_vm0 = vmmov 0   ;;  %v1443_v1 = vmov 0.0   ;;  %v292_v2 = vld [vmem:[#allocation5] sm:$0xff] }
  0x85   : > { %1059 = vmatprep.subr.bf16.mxu0 %v1441_v0  ;;  %968 = vmatprep.mubr.msk.f32.mxu0 %vm1442_vm0, %v1443_v1  ;;  %v293_v3 = vld [vmem:[#allocation5 + $0x8] sm:$0xff]  ;;  %v294_v4 = vld [vmem:[#allocation5 + $0x10] sm:$0xff]  ;;  %v295_v6 = vld [vmem:[#allocation5 + $0x18] sm:$0xff]  ;;  %s286_s24 = scalar_lea.vmem [#allocation10], %s1148_s10  ;;  %s878_s27 = smul.u32 384, %s1498_s22 }
  0x86   : > { %1083 = vmatprep.subr.bf16.mxu1 %v1441_v0  ;;  %1009 = vmatprep.mubr.msk.f32.mxu1 %vm1442_vm0, %v1443_v1  ;;  %v1060_v5 = vpack.c.bf16 %v293_v3, %v292_v2  ;;  %v1063_v7 = vpack.c.bf16 %v295_v6, %v294_v4  ;;  %v296_v8 = vld [vmem:[#allocation5 + $0x20] sm:$0xff]  ;;  %v297_v9 = vld [vmem:[#allocation5 + $0x28] sm:$0xff]  ;;  %v298_v11 = vld [vmem:[#allocation5 + $0x30] sm:$0xff]  ;;  %s754_s26 = sshll.u32 %s286_s24, 4  ;;  %s741_s10 = scalar_lea.sflag [#allocation4], %s1682_s17  ;;  %s1815_s26 = int_to_ptr.vmem [resolvable:$true] %s754_s26 }
  0x87   : > { %v1066_v10 = vpack.c.bf16 %v297_v9, %v296_v8  ;;  %v299_v12 = vld [vmem:[#allocation5 + $0x38] sm:$0xff]  ;;  %v300_v14 = vld [vmem:[#allocation5 + $0x40] sm:$0xff]  ;;  %v301_v15 = vld [vmem:[#allocation5 + $0x48] sm:$0xff]  ;;  %s1820_s28 = scalar_lea.hbm %s1869_s5, %s878_s27  ;;  %s1359_s22 = scalar_lea.vmem %s1815_s26, 384 }
  0x88   : > { %1061 = vmatpush3.bf16.msra.mxu0 %v1060_v5  ;;  %v1069_v13 = vpack.c.bf16 %v299_v12, %v298_v11  ;;  %v1072_v16 = vpack.c.bf16 %v301_v15, %v300_v14  ;;  %v302_v17 = vld [vmem:[#allocation5 + $0x50] sm:$0xff]  ;;  %v303_v18 = vld [vmem:[#allocation5 + $0x58] sm:$0xff]  ;;  %v304_v20 = vld [vmem:[#allocation5 + $0x60] sm:$0xff]  ;;  %p1360_p10 = scmp.ne.s32.totalorder %s1815_s26, %s1359_s22  ;;  %s1444_s13 = smov [#allocation10]  }
  0x89   : > { %1062 = vmatprep.subr.bf16.mxu0 %v1441_v0  ;;  %v1075_v19 = vpack.c.bf16 %v303_v18, %v302_v17  ;;  %v305_v21 = vld [vmem:[#allocation5 + $0x68] sm:$0xff]  ;;  %v306_v23 = vld [vmem:[#allocation5 + $0x70] sm:$0xff]  ;;  %v307_v24 = vld [vmem:[#allocation5 + $0x78] sm:$0xff]  ;;  %s1363_s9 = sshll.u32 %s1444_s13, 4  ;;  %s1364_s9 = int_to_ptr.vmem [resolvable:$false] %s1363_s9 }
  0x8a   : > { %v1078_v22 = vpack.c.bf16 %v305_v21, %v304_v20  ;;  %v1081_v25 = vpack.c.bf16 %v307_v24, %v306_v23  ;;  %v289_v26 = vld [vmem:[%s1688_s11] sm:$0xff]  ;;  %v290_v27 = vld [vmem:[%s1688_s11 + $0x8] sm:$0xff]  ;;  %v291_v28 = vld [vmem:[%s1688_s11 + $0x10] sm:$0xff]  ;;  %p1361_p3 = pnand %p1360_p10, %p1631_p5  ;;  %s1365_s8 = scalar_lea.vmem %s1364_s9, 768 }
  0x8b   : > { %v867_v29 = vld [vmem:[%s1868_s4] ss:$0 sm:$0xff]  ;;  %v463_v42 = vld [vmem:[#allocation7] sm:$0xff]  ;;  %v464_v43 = vld [vmem:[#allocation7 + $0x8] sm:$0xff]  ;;  %p1366_p12 = scmp.lt.s32.totalorder %s1815_s26, %s1364_s9  ;;  %p1367_p1 = scmp.lt.s32.totalorder %s1365_s8, %s1359_s22 }
  0x8c   : > { %1064 = vmatpush3.bf16.msra.mxu0 %v1063_v7  ;;  %v1084_v44 = vpack.c.bf16 %v464_v43, %v463_v42  ;;  %v465_v45 = vld [vmem:[#allocation7 + $0x10] sm:$0xff]  ;;  %v466_v46 = vld [vmem:[#allocation7 + $0x18] sm:$0xff]  ;;  %v467_v48 = vld [vmem:[#allocation7 + $0x20] sm:$0xff]  ;;  %p1362_p7 = pneg %p1361_p3 }
  0x8d   : > { %1065 = vmatprep.subr.bf16.mxu0 %v1441_v0  ;;  %v1087_v47 = vpack.c.bf16 %v466_v46, %v465_v45  ;;  %v468_v49 = vld [vmem:[#allocation7 + $0x28] sm:$0xff]  ;;  %v469_v51 = vld [vmem:[#allocation7 + $0x30] sm:$0xff]  ;;  %v470_v52 = vld [vmem:[#allocation7 + $0x38] sm:$0xff]  ;;  %p1368_p2 = por %p1367_p1, %p1366_p12 }
  0x8e   : > { %1085 = vmatpush3.bf16.msra.mxu1 %v1084_v44  ;;  %v1090_v50 = vpack.c.bf16 %v468_v49, %v467_v48  ;;  %v1093_v53 = vpack.c.bf16 %v470_v52, %v469_v51  ;;  %v471_v54 = vld [vmem:[#allocation7 + $0x40] sm:$0xff]  ;;  %v472_v55 = vld [vmem:[#allocation7 + $0x48] sm:$0xff]  ;;  %v473_v57 = vld [vmem:[#allocation7 + $0x50] sm:$0xff] }
  0x8f   : > { %1086 = vmatprep.subr.bf16.mxu1 %v1441_v0  ;;  %v1096_v56 = vpack.c.bf16 %v472_v55, %v471_v54  ;;  %v474_v58 = vld [vmem:[#allocation7 + $0x58] sm:$0xff]  ;;  %v475_v60 = vld [vmem:[#allocation7 + $0x60] sm:$0xff]  ;;  %v476_v61 = vld [vmem:[#allocation7 + $0x68] sm:$0xff]  ;;  %p1369_p4 = pnand %p1368_p2, %p1362_p7 }
  0x90   : > { %1067 = vmatpush3.bf16.msra.mxu0 %v1066_v10  ;;  %v1099_v59 = vpack.c.bf16 %v474_v58, %v473_v57  ;;  %v1102_v62 = vpack.c.bf16 %v476_v61, %v475_v60  ;;  %v477_v63 = vld [vmem:[#allocation7 + $0x70] sm:$0xff]  ;;  %v478_v2 = vld [vmem:[#allocation7 + $0x78] sm:$0xff] }
  0x91   : > { %1068 = vmatprep.subr.bf16.mxu0 %v1441_v0  ;;  %v1105_v3 = vpack.c.bf16 %v478_v2, %v477_v63  ;;  %v634_v2 = vld [vmem:[#allocation8] sm:$0xff] }
  0x92   : > { %1088 = vmatpush3.bf16.msra.mxu1 %v1087_v47 }
  0x93   : > { %1089 = vmatprep.subr.bf16.mxu1 %v1441_v0 }
  0x94   : > { %1070 = vmatpush3.bf16.msra.mxu0 %v1069_v13 }
  0x95   : > { %1071 = vmatprep.subr.bf16.mxu0 %v1441_v0 }
  0x96   : > { %1091 = vmatpush3.bf16.msra.mxu1 %v1090_v50 }
  0x97   : > { %1092 = vmatprep.subr.bf16.mxu1 %v1441_v0 }
  0x98   : > { %1073 = vmatpush3.bf16.msra.mxu0 %v1072_v16 }
  0x99   : > { %1074 = vmatprep.subr.bf16.mxu0 %v1441_v0 }
  0x9a   : > { %1094 = vmatpush3.bf16.msra.mxu1 %v1093_v53  ;;  %v870_v53 = vld [vmem:[%s1868_s4 + $0x3] ss:$0 sm:$0xff] }
  0x9b   : > { %1095 = vmatprep.subr.bf16.mxu1 %v1441_v0 }
  0x9c   : > { %1076 = vmatpush3.bf16.msra.mxu0 %v1075_v19 }
  0x9d   : > { %1077 = vmatprep.subr.bf16.mxu0 %v1441_v0 }
  0x9e   : > { %1097 = vmatpush3.bf16.msra.mxu1 %v1096_v56 }
  0x9f   : > { %1098 = vmatprep.subr.bf16.mxu1 %v1441_v0 }
  0xa0   : > { %1079 = vmatpush3.bf16.msra.mxu0 %v1078_v22 }
  0xa1   : > { %1080 = vmatprep.subr.bf16.mxu0 %v1441_v0 }
  0xa2   : > { %1100 = vmatpush3.bf16.msra.mxu1 %v1099_v59 }
  0xa3   : > { %1101 = vmatprep.subr.bf16.mxu1 %v1441_v0 }
  0xa4   : > { %1082 = vmatpush3.bf16.msra.mxu0 %v1081_v25 }
  0xa5   : > { %1107 = vmatprep.subr.bf16.mxu0 %v1441_v0 }
  0xa6   : > { %1103 = vmatpush3.bf16.msra.mxu1 %v1102_v62 }
  0xa7   : > { %969 = vmatmul.mubr.f32.vlgmr.msra.gmra.mrb[0].mxu0 %v289_v26  ;;  %1104 = vmatprep.subr.bf16.mxu1 %v1441_v0 }
  0xa8   : > { %971 = vmatprep.mubr.msk.f32.mxu0 %vm1442_vm0, %v1443_v1 }
  0xaa   : > { %1106 = vmatpush3.bf16.msra.mxu1 %v1105_v3  ;;  %v635_v3 = vld [vmem:[#allocation8 + $0x8] sm:$0xff] }
  0xab   : > { %972 = vmatmul.mubr.f32.gmra.mrb[2].mxu0 %v290_v27  ;;  %1131 = vmatprep.subr.bf16.mxu1 %v1441_v0 }
  0xac   : > { %974 = vmatprep.mubr.msk.f32.mxu0 %vm1442_vm0, %v1443_v1 }
  0xaf   : > { %975 = vmatmul.mubr.f32.gmra.mrb[4].mxu0 %v291_v28 }
  0xb0   : > { %1050 = vmatprep.mubr.msk.f32.mxu0 %vm1442_vm0, %v1443_v1 }
 0x17a   : > { %v383_v30 = vpop.f32.mrb[0].mxu0 }
 0x17b   : > { %v1728_v31 = vadd.f32 %v867_v29, %v383_v30  ;;  %v970_v32 = vpop.f32.mrb[1].mxu0  ;;  %v868_v30 = vld [vmem:[%s1868_s4 + $0x1] ss:$0 sm:$0xff] }
 0x17d   : > { %397 = vadd.xlane.f32.xlu0 %v1728_v31  ;;  %v406_v36 = vmul.f32 %v1728_v31, %v1728_v31 }
 0x17e   : > { %v388_v33 = vpop.f32.mrb[2].mxu0 }
 0x17f   : > { %v1731_v34 = vadd.f32 %v867_v29, %v388_v33  ;;  %v973_v35 = vpop.f32.mrb[3].mxu0  ;;  %v869_v33 = vld [vmem:[%s1868_s4 + $0x2] ss:$0 sm:$0xff] }
 0x181   : > { %409 = vadd.xlane.f32.xlu0 %v406_v36  ;;  %399 = vadd.xlane.f32.xlu1 %v1731_v34  ;;  %v407_v39 = vmul.f32 %v1731_v34, %v1731_v34 }
 0x182   : > { %v393_v37 = vpop.f32.mrb[4].mxu0 }
 0x183   : > { %v1736_v38 = vadd.f32 %v867_v29, %v393_v37  ;;  %v976_v40 = vpop.f32.mrb[5].mxu0 }
 0x185   : > { %411 = vadd.xlane.f32.xlu1 %v407_v39  ;;  %401 = vadd.xlane.f32.xlu0 %v1736_v38  ;;  %v408_v41 = vmul.f32 %v1736_v38, %v1736_v38 }
 0x189   : > { %413 = vadd.xlane.f32.xlu1 %v408_v41 }
 0x20a   : > { %v398_v4 = vpop.xlane.xlu0 %397 }
 0x20b   : > { %v403_v5 = vmul.f32 0.015625, %v398_v4  ;;  %v1108_v4 = vpack.c.bf16 %v635_v3, %v634_v2 }
 0x20d   : > { %v418_v8 = vmul.f32 %v403_v5, %v403_v5  ;;  %v427_v28 = vsub.f32 %v1728_v31, %v403_v5  ;;  %1109 = vmatpush3.bf16.msra.mxu0 %v1108_v4  ;;  %v636_v5 = vld [vmem:[#allocation8 + $0x10] sm:$0xff] }
 0x20e   : > { %v410_v6 = vpop.xlane.xlu0 %409  ;;  %v400_v7 = vpop.xlane.xlu1 %399  ;;  %1110 = vmatprep.subr.bf16.mxu0 %v1441_v0 }
 0x20f   : > { %v415_v9 = vmul.f32 0.015625, %v410_v6  ;;  %v404_v10 = vmul.f32 0.015625, %v400_v7  ;;  %v637_v6 = vld [vmem:[#allocation8 + $0x18] sm:$0xff] }
 0x210   : > { %v1111_v7 = vpack.c.bf16 %v637_v6, %v636_v5 }
 0x211   : > { %v421_v11 = vsub.f32 %v415_v9, %v418_v8  ;;  %v419_v15 = vmul.f32 %v404_v10, %v404_v10  ;;  %v428_v35 = vsub.f32 %v1731_v34, %v404_v10  ;;  %v638_v8 = vld [vmem:[#allocation8 + $0x20] sm:$0xff]  ;;  %v639_v9 = vld [vmem:[#allocation8 + $0x28] sm:$0xff] }
 0x212   : > { %v412_v12 = vpop.xlane.xlu1 %411  ;;  %v402_v13 = vpop.xlane.xlu0 %401  ;;  %1112 = vmatpush3.bf16.msra.mxu0 %v1111_v7  ;;  %v1114_v10 = vpack.c.bf16 %v639_v9, %v638_v8 }
 0x213   : > { %v424_v14 = vmax.f32 %v421_v11, 0.0  ;;  %v416_v16 = vmul.f32 0.015625, %v412_v12  ;;  %v405_v17 = vmul.f32 0.015625, %v402_v13  ;;  %1113 = vmatprep.subr.bf16.mxu0 %v1441_v0  ;;  %v640_v11 = vld [vmem:[#allocation8 + $0x30] sm:$0xff]  ;;  %v641_v12 = vld [vmem:[#allocation8 + $0x38] sm:$0xff] }
 0x214   : > { %v1117_v13 = vpack.c.bf16 %v641_v12, %v640_v11 }
 0x215   : > { %v430_v18 = vadd.f32 1e-05, %v424_v14  ;;  %v422_v19 = vsub.f32 %v416_v16, %v419_v15  ;;  %v420_v20 = vmul.f32 %v405_v17, %v405_v17  ;;  %v429_v41 = vsub.f32 %v1736_v38, %v405_v17  ;;  %v642_v14 = vld [vmem:[#allocation8 + $0x40] sm:$0xff]  ;;  %v643_v15 = vld [vmem:[#allocation8 + $0x48] sm:$0xff]  ;;  %v644_v17 = vld [vmem:[#allocation8 + $0x50] sm:$0xff] }
 0x216   : > { %v414_v21 = vpop.xlane.xlu1 %413  ;;  %1115 = vmatpush3.bf16.msra.mxu0 %v1114_v10  ;;  %v1120_v16 = vpack.c.bf16 %v643_v15, %v642_v14 }
 0x217   : > { %1233 = vrsqrt.f32 %v430_v18  ;;  %v425_v22 = vmax.f32 %v422_v19, 0.0  ;;  %v417_v23 = vmul.f32 0.015625, %v414_v21  ;;  %1116 = vmatprep.subr.bf16.mxu0 %v1441_v0  ;;  %v645_v18 = vld [vmem:[#allocation8 + $0x58] sm:$0xff]  ;;  %v647_v21 = vld [vmem:[#allocation8 + $0x68] sm:$0xff] }
 0x218   : > { %v1123_v19 = vpack.c.bf16 %v645_v18, %v644_v17 }
 0x219   : > { %v431_v24 = vadd.f32 1e-05, %v425_v22  ;;  %v423_v25 = vsub.f32 %v417_v23, %v420_v20  ;;  %v646_v20 = vld [vmem:[#allocation8 + $0x60] sm:$0xff]  ;;  %v648_v23 = vld [vmem:[#allocation8 + $0x70] sm:$0xff] }
 0x21a   : > { %1118 = vmatpush3.bf16.msra.mxu0 %v1117_v13  ;;  %v1126_v22 = vpack.c.bf16 %v647_v21, %v646_v20 }
 0x21b   : > { %1235 = vrsqrt.f32 %v431_v24  ;;  %v426_v26 = vmax.f32 %v423_v25, 0.0  ;;  %1119 = vmatprep.subr.bf16.mxu0 %v1441_v0  ;;  %v649_v24 = vld [vmem:[#allocation8 + $0x78] sm:$0xff] }
 0x21c   : > { %v1129_v25 = vpack.c.bf16 %v649_v24, %v648_v23 }
 0x21d   : > { %v432_v27 = vadd.f32 1e-05, %v426_v26 }
 0x21e   : > { %1121 = vmatpush3.bf16.msra.mxu0 %v1120_v16 }
 0x21f   : > { %1237 = vrsqrt.f32 %v432_v27  ;;  %1122 = vmatprep.subr.bf16.mxu0 %v1441_v0 }
 0x221   : > { %v1234_v29 = vpop.eup %1233 }
 0x222   : > { %v436_v32 = vmul.f32 %v1234_v29, %v427_v28  ;;  %1124 = vmatpush3.bf16.msra.mxu0 %v1123_v19 }
 0x223   : > { %1125 = vmatprep.subr.bf16.mxu0 %v1441_v0 }
 0x224   : > { %v445_v36 = vmul.f32 %v868_v30, %v436_v32 }
 0x225   : > { %v1236_v37 = vpop.eup %1235 }
 0x226   : > { %v454_v39 = vadd.f32 %v869_v33, %v445_v36  ;;  %v437_v40 = vmul.f32 %v1236_v37, %v428_v35  ;;  %1127 = vmatpush3.bf16.msra.mxu0 %v1126_v22 }
 0x227   : > { %1128 = vmatprep.subr.bf16.mxu0 %v1441_v0 }
 0x228   : > { %v457_v42 = vmul.f32 0.2, %v454_v39  ;;  %v446_v31 = vmul.f32 %v868_v30, %v437_v40 }
 0x229   : > { %v1238_v43 = vpop.eup %1237 }
 0x22a   : > { %v460_v44 = vmax.f32 %v454_v39, %v457_v42  ;;  %v455_v45 = vadd.f32 %v869_v33, %v446_v31  ;;  %v438_v46 = vmul.f32 %v1238_v43, %v429_v41  ;;  %1130 = vmatpush3.bf16.msra.mxu0 %v1129_v25 }
 0x22c   : > { %1010 = vmatmul.mubr.f32.vlgmr.msra.gmra.mrb[0].mxu1 %v460_v44  ;;  %v458_v47 = vmul.f32 0.2, %v455_v45  ;;  %v447_v48 = vmul.f32 %v868_v30, %v438_v46 }
 0x22d   : > { %1012 = vmatprep.mubr.msk.f32.mxu1 %vm1442_vm0, %v1443_v1  ;;  %1139 = vmatpush3.bf16.msra.mxu1 %v1108_v4 }
 0x22e   : > { %v461_v49 = vmax.f32 %v455_v45, %v458_v47  ;;  %v456_v34 = vadd.f32 %v869_v33, %v447_v48  ;;  %1132 = vmatprep.subr.bf16.mxu1 %v1441_v0 }
 0x230   : > { %1013 = vmatmul.mubr.f32.gmra.mrb[2].mxu1 %v461_v49  ;;  %v459_v50 = vmul.f32 0.2, %v456_v34 }
 0x231   : > { %1015 = vmatprep.mubr.msk.f32.mxu1 %vm1442_vm0, %v1443_v1  ;;  %1140 = vmatpush3.bf16.msra.mxu1 %v1111_v7 }
 0x232   : > { %v462_v38 = vmax.f32 %v456_v34, %v459_v50  ;;  %1133 = vmatprep.subr.bf16.mxu1 %v1441_v0 }
 0x234   : > { %1016 = vmatmul.mubr.f32.gmra.mrb[4].mxu1 %v462_v38 }
 0x235   : > { %1053 = vmatprep.mubr.msk.f32.mxu1 %vm1442_vm0, %v1443_v1  ;;  %1141 = vmatpush3.bf16.msra.mxu1 %v1114_v10  ;;  %v873_v10 = vld [vmem:[%s1868_s4 + $0x6] ss:$0 sm:$0xff] }
 0x236   : > { %1134 = vmatprep.subr.bf16.mxu1 %v1441_v0 }
 0x239   : > { %1142 = vmatpush3.bf16.msra.mxu1 %v1117_v13 }
 0x23a   : > { %1135 = vmatprep.subr.bf16.mxu1 %v1441_v0 }
 0x23d   : > { %1143 = vmatpush3.bf16.msra.mxu1 %v1120_v16 }
 0x23e   : > { %1136 = vmatprep.subr.bf16.mxu1 %v1441_v0 }
 0x241   : > { %1144 = vmatpush3.bf16.msra.mxu1 %v1123_v19 }
 0x242   : > { %1137 = vmatprep.subr.bf16.mxu1 %v1441_v0 }
 0x245   : > { %1145 = vmatpush3.bf16.msra.mxu1 %v1126_v22 }
 0x246   : > { %1138 = vmatprep.subr.bf16.mxu1 %v1441_v0 }
 0x249   : > { %1146 = vmatpush3.bf16.msra.mxu1 %v1129_v25 }
 0x2ff   : > { %v554_v51 = vpop.f32.mrb[0].mxu1 }
 0x300   : > { %v1011_v52 = vpop.f32.mrb[1].mxu1  ;;  %v1774_v59 = vadd.f32 %v870_v53, %v554_v51  ;;  %v871_v51 = vld [vmem:[%s1868_s4 + $0x4] ss:$0 sm:$0xff] }
 0x302   : > { %v577_v62 = vmul.f32 %v1774_v59, %v1774_v59 }
 0x303   : > { %v559_v54 = vpop.f32.mrb[2].mxu1 }
 0x304   : > { %v1769_v55 = vadd.f32 %v870_v53, %v559_v54  ;;  %v1014_v56 = vpop.f32.mrb[3].mxu1 }
 0x306   : > { %570 = vadd.xlane.f32.xlu0 %v1769_v55  ;;  %v578_v57 = vmul.f32 %v1769_v55, %v1769_v55 }
 0x307   : > { %v564_v58 = vpop.f32.mrb[4].mxu1 }
 0x308   : > { %582 = vadd.xlane.f32.xlu1 %v578_v57  ;;  %v1017_v60 = vpop.f32.mrb[5].mxu1  ;;  %v1776_v61 = vadd.f32 %v870_v53, %v564_v58  ;;  %v872_v53 = vld [vmem:[%s1868_s4 + $0x5] ss:$0 sm:$0xff] }
 0x30a   : > { %568 = vadd.xlane.f32.xlu0 %v1774_v59  ;;  %v579_v63 = vmul.f32 %v1776_v61, %v1776_v61 }
 0x30c   : > { %572 = vadd.xlane.f32.xlu1 %v1776_v61 }
 0x30e   : > { %580 = vadd.xlane.f32.xlu0 %v577_v62 }
 0x310   : > { %584 = vadd.xlane.f32.xlu1 %v579_v63 }
 0x393   : > { %v571_v26 = vpop.xlane.xlu0 %570 }
 0x394   : > { %v575_v27 = vmul.f32 0.03125, %v571_v26 }
 0x395   : > { %v583_v28 = vpop.xlane.xlu1 %582 }
 0x396   : > { %v590_v29 = vmul.f32 %v575_v27, %v575_v27  ;;  %v587_v30 = vmul.f32 0.03125, %v583_v28  ;;  %v599_v50 = vsub.f32 %v1769_v55, %v575_v27 }
 0x397   : > { %v569_v32 = vpop.xlane.xlu0 %568 }
 0x398   : > { %v593_v33 = vsub.f32 %v587_v30, %v590_v29  ;;  %v574_v35 = vmul.f32 0.03125, %v569_v32 }
 0x399   : > { %v573_v36 = vpop.xlane.xlu1 %572 }
 0x39a   : > { %v596_v37 = vmax.f32 %v593_v33, 0.0  ;;  %v576_v39 = vmul.f32 0.03125, %v573_v36  ;;  %v589_v42 = vmul.f32 %v574_v35, %v574_v35  ;;  %v598_v56 = vsub.f32 %v1774_v59, %v574_v35 }
 0x39b   : > { %v581_v40 = vpop.xlane.xlu0 %580 }
 0x39c   : > { %v602_v41 = vadd.f32 1e-05, %v596_v37  ;;  %v586_v31 = vmul.f32 0.03125, %v581_v40  ;;  %v591_v0 = vmul.f32 %v576_v39, %v576_v39  ;;  %v600_v60 = vsub.f32 %v1776_v61, %v576_v39 }
 0x39d   : > { %v585_v43 = vpop.xlane.xlu1 %584 }
 0x39e   : > { %1239 = vrsqrt.f32 %v602_v41  ;;  %v592_v44 = vsub.f32 %v586_v31, %v589_v42  ;;  %v588_v45 = vmul.f32 0.03125, %v585_v43 }
 0x3a0   : > { %v595_v46 = vmax.f32 %v592_v44, 0.0  ;;  %v594_v47 = vsub.f32 %v588_v45, %v591_v0 }
 0x3a2   : > { %v601_v48 = vadd.f32 1e-05, %v595_v46  ;;  %v597_v49 = vmax.f32 %v594_v47, 0.0 }
 0x3a4   : > { %1241 = vrsqrt.f32 %v601_v48  ;;  %v603_v34 = vadd.f32 1e-05, %v597_v49 }
 0x3a6   : > { %1243 = vrsqrt.f32 %v603_v34 }
 0x3a8   : > { %v1240_v38 = vpop.eup %1239 }
 0x3a9   : > { %v608_v52 = vmul.f32 %v1240_v38, %v599_v50 }
 0x3ab   : > { %v617_v54 = vmul.f32 %v871_v51, %v608_v52 }
 0x3ad   : > { %v626_v57 = vadd.f32 %v872_v53, %v617_v54 }
 0x3ae   : > { %v1242_v58 = vpop.eup %1241 }
 0x3af   : > { %v607_v62 = vmul.f32 %v1242_v58, %v598_v56  ;;  %v629_v63 = vmul.f32 0.2, %v626_v57 }
 0x3b0   : > { %v1244_v55 = vpop.eup %1243 }
 0x3b1   : > { %v632_v2 = vmax.f32 %v626_v57, %v629_v63  ;;  %v616_v3 = vmul.f32 %v871_v51, %v607_v62  ;;  %v609_v4 = vmul.f32 %v1244_v55, %v600_v60 }
 0x3b3   : > { %1054 = vmatmul.mubr.f32.vlgmr.msra.gmra.mrb[6].mxu1 %v632_v2  ;;  %v625_v5 = vadd.f32 %v872_v53, %v616_v3  ;;  %v618_v6 = vmul.f32 %v871_v51, %v609_v4 }
 0x3b4   : > { %1056 = vmatprep.mubr.msk.f32.mxu1 %vm1442_vm0, %v1443_v1 }
 0x3b5   : > { %v628_v7 = vmul.f32 0.2, %v625_v5  ;;  %v627_v59 = vadd.f32 %v872_v53, %v618_v6 }
 0x3b7   : > { %v631_v8 = vmax.f32 %v625_v5, %v628_v7  ;;  %v630_v9 = vmul.f32 0.2, %v627_v59 }
 0x3b9   : > { %1051 = vmatmul.mubr.f32.vlgmr.msra.gmra.mrb[6].mxu0 %v631_v8  ;;  %v633_v61 = vmax.f32 %v627_v59, %v630_v9 }
 0x3bb   : > { %1057 = vmatmul.mubr.f32.gmra.mrb[8].mxu1 %v633_v61 }
 0x486   : > { %v728_v11 = vpop.f32.mrb[6].mxu1 }
 0x487   : > { %v729_v12 = vadd.f32 %v873_v10, %v728_v11  ;;  %v1055_v13 = vpop.f32.mrb[7].mxu1 }
 0x489   : > { %738 = vst [vmem:[%s286_s24 + $0x8] sm:$0xff] %v729_v12 }
 0x48c   : > { %v723_v1 = vpop.f32.mrb[6].mxu0 }
 0x48d   : > { %v724_v14 = vadd.f32 %v873_v10, %v723_v1  ;;  %v1052_v15 = vpop.f32.mrb[7].mxu0 }
 0x48e   : > { %v733_v16 = vpop.f32.mrb[8].mxu1 }
 0x48f   : > { %737 = vst [vmem:[%s286_s24] sm:$0xff] %v724_v14  ;;  %v734_v17 = vadd.f32 %v873_v10, %v733_v16  ;;  %v1058_v18 = vpop.f32.mrb[9].mxu1 }
 0x491   : > { %739 = vst [vmem:[%s286_s24 + $0x10] sm:$0xff] %v734_v17 }
 0x492   : > { %1372 = shalt.err (!%p1369_p4)
}
 0x493   : > { %s1373_s16 = scalar_lea.hbm %s1820_s28, 384  ;;  %s1377_s12 = scalar_lea.hbm %s1869_s5, 768 }
 0x494   : > { %p1374_p9 = scmp.ne.s32.totalorder %s1820_s28, %s1373_s16  ;;  %p1378_p8 = scmp.lt.u32.totalorder %s1820_s28, %s1869_s5 }
 0x495   : > { %p1379_p13 = scmp.lt.u32.totalorder %s1377_s12, %s1373_s16  ;;  %p1381_p10 = scmp.lt.u32.totalorder %s1373_s16, %s1820_s28 }
 0x496   : > { %p1375_p0 = pnand %p1374_p9, %p1631_p5 }
 0x497   : > { %p1380_p6 = por %p1379_p13, %p1378_p8 }
 0x498   : > { %p1376_p11 = pneg %p1375_p0 }
 0x499   : > { %p1382_p3 = por %p1381_p10, %p1380_p6 }
 0x49b   : > { %p1383_p7 = pnand %p1382_p3, %p1376_p11 }
 0x49d   : > { %1386 = shalt.err (!%p1383_p7)
}
 0x49e   : > { %s1445_s27 = smov 128   ;;  %s1446_s15 = smov 8  }
 0x49f   : > { %1163 = dma.vmem_to_hbm [thread:$0]  (%p1631_p5), %s1815_s26, 384, %s1820_s28, %s741_s10, %s1445_s27, %s1445_s27, %s1446_s15  }
 0x4a0 PF: > { %s769_s6 = sand.u32 1, %s1421_s18   ;;  %p1889_p12 = scmp.ne.s32.totalorder %s1875_s25, 0 }
 0x4a1   : > { %p1890_p1 = scmp.ge.s32.totalorder %s1433_s21, 2  ;;  %s770_s22 = scalar_lea.sflag [#allocation4], %s769_s6 }
 0x4a3   : > { %p1180_p2 = pnand %p1890_p1, %p1889_p12 }
 0x4a5   : > { %1416 = dma.done.wait (!%p1180_p2), %s770_s22, 384  }
 0x4a6   : > { %1418 = vsyncadd (!%p1180_p2), %s770_s22, 4294966912  ;;  %p20_p4 = scmp.ge.s32.totalorder %s1617_s14, 4   ;;  %s1891_s18 = smov %s1425_s19 }
 0x4a7   : > { %s1892_s19 = smov %s1429_s20  ;;  %s1893_s20 = smov %s1627_s30 }
 0x4a8   : > { %s1894_s21 = smov %s1617_s14  ;;  %22 = sbr.rel (!%p20_p4) target bundleno = 7 (0x7), region = 97 }
 0x4af   :  { %775 = vsyncpa [#allocation3], 1 }
 0x4b0   :  { %777 = vsyncpa [#allocation3 + $0x1], 1 }
 0x4b1   :  { %778 = vsyncpa [#allocation6], 1 }
 0x4b2   :  { %779 = vsyncpa [#allocation9], 1 }
 0x4b3   :  { %780 = vsyncpa [#allocation4], 1 }
 0x4b4   :  { %782 = vsyncpa [#allocation4 + $0x1], 1 }

</bundles_post_ra>
